<compile_context>
chip_gen: v7x
topology: tpu7x:2x2x1
jax: 0.10.0
libtpu: 0.0.40
codegen_flags: <defaults>
</compile_context>

<pallas_src>
import math

import jax
import jax.numpy as jnp
from jax import lax
from jax.experimental import pallas as pl
from jax.experimental.pallas import tpu as pltpu

# ------------------------- small synthetic config ---------------------------
B = 2                 # batch
H = 16                # feature-map height
W = 16                # feature-map width
C_IN = 4              # backbone output channels
HIDDEN = 32           # transformer.d_model
GROUPS = 32           # GroupNorm(32, hidden)
L_DEC = 3             # transformer.num_decoder_layers
Q = 16                # num_queries
NUM_CLASSES = 8
NUM_VERB_CLASSES = 8
GN_EPS = 1e-5
INVSIG_EPS = 1e-3
PRIOR_PROB = 0.01
BIAS_VALUE = -math.log((1.0 - PRIOR_PROB) / PRIOR_PROB)

HW = H * W                         # 256 -> dense lane axis for input_proj
N_TOK = L_DEC * B * Q              # 96 flattened decoder tokens
CG = HIDDEN // GROUPS              # channels per GroupNorm group (1 here)
N_BOX = 8                          # [sub(4) | obj(4)] box columns
N_LOGIT = NUM_CLASSES + NUM_VERB_CLASSES   # [cls(8) | verb(8)] logit columns

_VMEM = pl.BlockSpec(memory_space=pltpu.MemorySpace.VMEM)


# ========================= single fused DINO kernel ==========================
def _dino_fused_kernel(x_ref, w_ref, aff_ref, xcat_ref, ref8_ref,
                       w1_ref, b1_ref, w2_ref, b2_ref,
                       w3b_ref, b3b_ref, w3l_ref, b3l_ref,
                       src_ref, box_ref, logit_ref):
    # ---------------- input_proj: 1x1 conv + GroupNorm(32, HIDDEN) ----------
    # x_ref: (B, C_IN, HW)   w_ref: (HIDDEN, C_IN)
    # aff_ref: (HIDDEN, 2) = [gamma | beta]   (conv bias dropped: cg == 1)
    x = x_ref[...]
    w = w_ref[...]
    aff = aff_ref[...]
    # K = C_IN = 4 contraction on the VPU: 4 broadcast-FMAs, no MXU fill/drain.
    y = w[None, :, 0:1] * x[:, 0:1, :]                       # (B, HIDDEN, HW)
    for c in range(1, C_IN):
        y = y + w[None, :, c:c + 1] * x[:, c:c + 1, :]
    if CG == 1:
        # one channel per group: GroupNorm == per-channel norm over HW (lanes);
        # the conv bias is exactly cancelled by the mean subtraction.
        gamma = aff[:, 0:1][None]                            # (1, HIDDEN, 1)
        beta = aff[:, 1:2][None]
        mean = jnp.mean(y, axis=-1, keepdims=True)
        var = jnp.mean((y - mean) ** 2, axis=-1, keepdims=True)
        yn = (y - mean) * lax.rsqrt(var + GN_EPS)
    else:
        # general grouped path (not traced in this config; bias must be kept).
        bias = aff[:, 0:1][None]
        gamma = aff[:, 1:2][None]
        beta = aff[:, 2:3][None]
        yg = (y + bias).reshape(B, GROUPS, CG, HW)
        mean = jnp.mean(yg, axis=(2, 3), keepdims=True)
        var = jnp.mean((yg - mean) ** 2, axis=(2, 3), keepdims=True)
        yn = ((yg - mean) * lax.rsqrt(var + GN_EPS)).reshape(B, HIDDEN, HW)
    src_ref[...] = yn * gamma + beta

    # ---------------- prediction heads (all L*B*Q tokens at once) -----------
    # xcat_ref: (N_TOK, 3*HIDDEN) columns = [h_hs | o_hs | hoi]
    # ref8_ref: (N_TOK, 8)        columns = [h_ref(4) | o_ref(4)]
    # w1: (96,64) block-diag(sub_w1, obj_w1);  w2: (64,64) block-diag(sub_w2, obj_w2)
    # w3b: (64,8)  sub_w3 -> cols 0:4, obj_w3 -> cols 4:8
    # w3l: (96,16) cls_w (rows 32:64) -> cols 0:8, verb_w (rows 64:96) -> cols 8:16
    xc = xcat_ref[...]
    h1 = jnp.maximum(
        jnp.dot(xc, w1_ref[...], preferred_element_type=jnp.float32) + b1_ref[...], 0.0)
    h2 = jnp.maximum(
        jnp.dot(h1, w2_ref[...], preferred_element_type=jnp.float32) + b2_ref[...], 0.0)
    # inverse_sigmoid on the 8 real box columns only (one EUP log via log(x1/x2))
    r = jnp.clip(ref8_ref[...], 0.0, 1.0)
    inv = jnp.log(jnp.clip(r, INVSIG_EPS, None) / jnp.clip(1.0 - r, INVSIG_EPS, None))
    box_pre = (jnp.dot(h2, w3b_ref[...], preferred_element_type=jnp.float32)
               + b3b_ref[...] + inv)                          # (N_TOK, 8)
    box_ref[...] = jax.nn.sigmoid(box_pre)
    logit_ref[...] = (jnp.dot(xc, w3l_ref[...], preferred_element_type=jnp.float32)
                      + b3l_ref[...])                         # (N_TOK, 16)


# ===================== one-time parameter slab packing ======================
def pack_params(p):
    """Pack the 16 raw parameter tensors into block-structured slabs ONCE
    (outside the jit / per-forward path)."""
    D = HIDDEN
    f32 = jnp.float32
    packed = {"proj_w": p["proj_w"]}
    if CG == 1:
        # conv bias dropped (cancelled by per-channel GroupNorm mean)
        packed["affine"] = jnp.stack([p["gn_gamma"], p["gn_beta"]], axis=1)
    else:
        packed["affine"] = jnp.stack([p["proj_b"], p["gn_gamma"], p["gn_beta"]], axis=1)

    w1 = jnp.zeros((3 * D, 2 * D), f32)
    w1 = w1.at[0:D, 0:D].set(p["sub_w1"]).at[D:2 * D, D:2 * D].set(p["obj_w1"])
    packed["w1"] = w1
    packed["b1"] = jnp.concatenate([p["sub_b1"], p["obj_b1"]])[None, :]

    w2 = jnp.zeros((2 * D, 2 * D), f32)
    w2 = w2.at[0:D, 0:D].set(p["sub_w2"]).at[D:2 * D, D:2 * D].set(p["obj_w2"])
    packed["w2"] = w2
    packed["b2"] = jnp.concatenate([p["sub_b2"], p["obj_b2"]])[None, :]

    w3b = jnp.zeros((2 * D, N_BOX), f32)
    w3b = w3b.at[0:D, 0:4].set(p["sub_w3"]).at[D:2 * D, 4:8].set(p["obj_w3"])
    packed["w3box"] = w3b
    packed["b3box"] = jnp.concatenate([p["sub_b3"], p["obj_b3"]])[None, :]

    w3l = jnp.zeros((3 * D, N_LOGIT), f32)
    w3l = w3l.at[D:2 * D, 0:NUM_CLASSES].set(p["cls_w"])
    w3l = w3l.at[2 * D:3 * D, NUM_CLASSES:].set(p["verb_w"])
    packed["w3log"] = w3l
    packed["b3log"] = jnp.concatenate([p["cls_b"], p["verb_b"]])[None, :]
    return packed


# =========================== fused forward (one jit) =========================
@jax.jit
def dino_forward(x, h_hs, o_hs, hoi, h_ref, o_ref, packed):
    # free layout plumbing (small) so the kernel sees flat, lane-dense slabs
    x3 = x.reshape(B, C_IN, HW)
    xcat = jnp.concatenate([h_hs, o_hs, hoi], axis=-1).reshape(N_TOK, 3 * HIDDEN)
    ref8 = jnp.concatenate([h_ref, o_ref], axis=-1).reshape(N_TOK, N_BOX)

    src, boxes, logits = pl.pallas_call(
        _dino_fused_kernel,
        out_shape=(
            jax.ShapeDtypeStruct((B, HIDDEN, HW), jnp.float32),
            jax.ShapeDtypeStruct((N_TOK, N_BOX), jnp.float32),
            jax.ShapeDtypeStruct((N_TOK, N_LOGIT), jnp.float32),
        ),
        in_specs=[_VMEM] * 13,
        out_specs=(_VMEM, _VMEM, _VMEM),
    )(x3, packed["proj_w"], packed["affine"], xcat, ref8,
      packed["w1"], packed["b1"], packed["w2"], packed["b2"],
      packed["w3box"], packed["b3box"], packed["w3log"], packed["b3log"])

    src = src.reshape(B, HIDDEN, H, W)
    boxes = boxes.reshape(L_DEC, B, Q, N_BOX)
    logits = logits.reshape(L_DEC, B, Q, N_LOGIT)
    sub_coord = boxes[..., 0:4]
    obj_coord = boxes[..., 4:8]
    obj_logits = logits[..., 0:NUM_CLASSES]
    verb_logits = logits[..., NUM_CLASSES:]
    return src, sub_coord, obj_coord, obj_logits, verb_logits


# ============================ parameter construction =========================
def make_params(key):
    ks = jax.random.split(key, 8)

    def xavier(k, shape):
        fan_in, fan_out = shape[0], shape[1]
        a = math.sqrt(6.0 / (fan_in + fan_out))
        return jax.random.uniform(k, shape, jnp.float32, -a, a)

    p = {}
    # input_proj: Conv2d(C_IN, HIDDEN, 1) xavier_uniform, bias=0; GroupNorm affine
    p["proj_w"] = xavier(ks[0], (HIDDEN, C_IN))
    p["proj_b"] = jnp.zeros((HIDDEN,), jnp.float32)
    p["gn_gamma"] = jnp.ones((HIDDEN,), jnp.float32)
    p["gn_beta"] = jnp.zeros((HIDDEN,), jnp.float32)

    # _sub_bbox_embed / _bbox_embed : MLP(hidden, hidden, 4, 3); last layer zeroed
    for name, k1, k2 in (("sub", ks[1], ks[2]), ("obj", ks[3], ks[4])):
        p[f"{name}_w1"] = xavier(k1, (HIDDEN, HIDDEN))
        p[f"{name}_b1"] = jnp.zeros((HIDDEN,), jnp.float32)
        p[f"{name}_w2"] = xavier(k2, (HIDDEN, HIDDEN))
        p[f"{name}_b2"] = jnp.zeros((HIDDEN,), jnp.float32)
        p[f"{name}_w3"] = jnp.zeros((HIDDEN, 4), jnp.float32)   # constant_(0)
        p[f"{name}_b3"] = jnp.zeros((4,), jnp.float32)          # constant_(0)

    # _class_embed / _verb_class_embed : Linear(hidden, n); bias = bias_value
    p["cls_w"] = xavier(ks[5], (HIDDEN, NUM_CLASSES))
    p["cls_b"] = jnp.full((NUM_CLASSES,), BIAS_VALUE, jnp.float32)
    p["verb_w"] = xavier(ks[6], (HIDDEN, NUM_VERB_CLASSES))
    p["verb_b"] = jnp.full((NUM_VERB_CLASSES,), BIAS_VALUE, jnp.float32)
    return p


# ================================ reference ==================================
def reference(x, h_hs, o_hs, hoi, h_ref, o_ref, p):
    # input_proj reference (NCHW), including the conv bias + full GroupNorm
    y = jnp.einsum("bchw,dc->bdhw", x, p["proj_w"]) + p["proj_b"][None, :, None, None]
    cg = HIDDEN // GROUPS
    yg = y.reshape(B, GROUPS, cg, H, W)
    mean = jnp.mean(yg, axis=(2, 3, 4), keepdims=True)
    var = jnp.mean((yg - mean) ** 2, axis=(2, 3, 4), keepdims=True)
    yn = ((yg - mean) / jnp.sqrt(var + GN_EPS)).reshape(B, HIDDEN, H, W)
    src = yn * p["gn_gamma"][None, :, None, None] + p["gn_beta"][None, :, None, None]

    def mlp(t, a):
        h = jax.nn.relu(t @ p[f"{a}_w1"] + p[f"{a}_b1"])
        h = jax.nn.relu(h @ p[f"{a}_w2"] + p[f"{a}_b2"])
        return h @ p[f"{a}_w3"] + p[f"{a}_b3"]

    def invsig(t, eps=INVSIG_EPS):
        t = jnp.clip(t, 0.0, 1.0)
        return jnp.log(jnp.clip(t, eps, None)) - jnp.log(jnp.clip(1.0 - t, eps, None))

    sub = jax.nn.sigmoid(mlp(h_hs, "sub") + invsig(h_ref))
    obj = jax.nn.sigmoid(mlp(o_hs, "obj") + invsig(o_ref))
    cls = o_hs @ p["cls_w"] + p["cls_b"]
    verb = hoi @ p["verb_w"] + p["verb_b"]
    return src, sub, obj, cls, verb


# =================================== main ====================================
if __name__ == "__main__":
    key = jax.random.PRNGKey(0)
    k_x, k_hh, k_oh, k_hoi, k_hr, k_or, k_p = jax.random.split(key, 7)

    # synthetic backbone feature map (stand-in for self.backbone(samples)), NCHW
    x = jax.random.normal(k_x, (B, C_IN, H, W), jnp.float32)

    # synthetic transformer decoder outputs (stand-in for self.transformer(...))
    h_hs = jax.random.normal(k_hh, (L_DEC, B, Q, HIDDEN), jnp.float32)
    o_hs = jax.random.normal(k_oh, (L_DEC, B, Q, HIDDEN), jnp.float32)
    hoi = jax.random.normal(k_hoi, (L_DEC, B, Q, HIDDEN), jnp.float32)
    h_ref = jax.random.uniform(k_hr, (L_DEC, B, Q, 4), jnp.float32, 0.05, 0.95)
    o_ref = jax.random.uniform(k_or, (L_DEC, B, Q, 4), jnp.float32, 0.05, 0.95)

    params = make_params(k_p)
    packed = jax.tree_util.tree_map(jax.block_until_ready, pack_params(params))  # hoisted, once

    src, sub_coord, obj_coord, obj_logits, verb_logits = dino_forward(
        x, h_hs, o_hs, hoi, h_ref, o_ref, packed)
    jax.block_until_ready((src, sub_coord, obj_coord, obj_logits, verb_logits))

    # assemble the output dict like DINO.forward (dn disabled, clip_loss=False)
    out = {
        "pred_obj_logits": obj_logits[-1],
        "pred_verb_logits": verb_logits[-1],
        "pred_sub_boxes": sub_coord[-1],
        "pred_obj_boxes": obj_coord[-1],
        "pred_feat": None,
        "dn_meta": None,
    }

    # numerical check vs. plain-JAX reference
    r_src, r_sub, r_obj, r_cls, r_verb = reference(
        x, h_hs, o_hs, hoi, h_ref, o_ref, params)
    assert jnp.allclose(src, r_src, atol=1e-4, rtol=1e-4)
    assert jnp.allclose(sub_coord, r_sub, atol=1e-5, rtol=1e-5)
    assert jnp.allclose(obj_coord, r_obj, atol=1e-5, rtol=1e-5)
    assert jnp.allclose(obj_logits, r_cls, atol=1e-4, rtol=1e-4)
    assert jnp.allclose(verb_logits, r_verb, atol=1e-4, rtol=1e-4)

    print("KERNEL_OK")
</pallas_src>

<mosaic_0001>
module attributes {stable_mosaic.version = 11 : i64} {
  func.func @_dino_fused_kernel(%arg0: memref<2x4x256xf32, #tpu.memory_space<vmem>>, %arg1: memref<32x4xf32, #tpu.memory_space<vmem>>, %arg2: memref<32x2xf32, #tpu.memory_space<vmem>>, %arg3: memref<96x96xf32, #tpu.memory_space<vmem>>, %arg4: memref<96x8xf32, #tpu.memory_space<vmem>>, %arg5: memref<96x64xf32, #tpu.memory_space<vmem>>, %arg6: memref<1x64xf32, #tpu.memory_space<vmem>>, %arg7: memref<64x64xf32, #tpu.memory_space<vmem>>, %arg8: memref<1x64xf32, #tpu.memory_space<vmem>>, %arg9: memref<64x8xf32, #tpu.memory_space<vmem>>, %arg10: memref<1x8xf32, #tpu.memory_space<vmem>>, %arg11: memref<96x16xf32, #tpu.memory_space<vmem>>, %arg12: memref<1x16xf32, #tpu.memory_space<vmem>>, %arg13: memref<2x32x256xf32, #tpu.memory_space<vmem>>, %arg14: memref<96x8xf32, #tpu.memory_space<vmem>>, %arg15: memref<96x16xf32, #tpu.memory_space<vmem>>) attributes {dimension_semantics = [], scalar_prefetch = 0 : i64, scratch_operands = 0 : i64, tpu.core_type = #tpu.core_type<tc>} {
    %c0 = arith.constant 0 : index
    %c0_0 = arith.constant 0 : index
    %c0_1 = arith.constant 0 : index
    %0 = vector.load %arg0[%c0, %c0_0, %c0_1] : memref<2x4x256xf32, #tpu.memory_space<vmem>>, vector<2x4x256xf32>
    %c0_2 = arith.constant 0 : index
    %c0_3 = arith.constant 0 : index
    %1 = vector.load %arg1[%c0_2, %c0_3] : memref<32x4xf32, #tpu.memory_space<vmem>>, vector<32x4xf32>
    %c0_4 = arith.constant 0 : index
    %c0_5 = arith.constant 0 : index
    %2 = vector.load %arg2[%c0_4, %c0_5] : memref<32x2xf32, #tpu.memory_space<vmem>>, vector<32x2xf32>
    %3 = vector.extract_strided_slice %1 {offsets = [0, 0], sizes = [32, 1], strides = [1, 1]} : vector<32x4xf32> to vector<32x1xf32>
    %4 = vector.shape_cast %3 : vector<32x1xf32> to vector<1x32x1xf32>
    %5 = vector.extract_strided_slice %0 {offsets = [0, 0, 0], sizes = [2, 1, 256], strides = [1, 1, 1]} : vector<2x4x256xf32> to vector<2x1x256xf32>
    %6 = vector.broadcast %4 : vector<1x32x1xf32> to vector<2x32x256xf32>
    %7 = vector.broadcast %5 : vector<2x1x256xf32> to vector<2x32x256xf32>
    %8 = arith.mulf %6, %7 : vector<2x32x256xf32>
    %9 = vector.extract_strided_slice %1 {offsets = [0, 1], sizes = [32, 1], strides = [1, 1]} : vector<32x4xf32> to vector<32x1xf32>
    %10 = vector.shape_cast %9 : vector<32x1xf32> to vector<1x32x1xf32>
    %11 = vector.extract_strided_slice %0 {offsets = [0, 1, 0], sizes = [2, 1, 256], strides = [1, 1, 1]} : vector<2x4x256xf32> to vector<2x1x256xf32>
    %12 = vector.broadcast %10 : vector<1x32x1xf32> to vector<2x32x256xf32>
    %13 = vector.broadcast %11 : vector<2x1x256xf32> to vector<2x32x256xf32>
    %14 = arith.mulf %12, %13 : vector<2x32x256xf32>
    %15 = arith.addf %8, %14 : vector<2x32x256xf32>
    %16 = vector.extract_strided_slice %1 {offsets = [0, 2], sizes = [32, 1], strides = [1, 1]} : vector<32x4xf32> to vector<32x1xf32>
    %17 = vector.shape_cast %16 : vector<32x1xf32> to vector<1x32x1xf32>
    %18 = vector.extract_strided_slice %0 {offsets = [0, 2, 0], sizes = [2, 1, 256], strides = [1, 1, 1]} : vector<2x4x256xf32> to vector<2x1x256xf32>
    %19 = vector.broadcast %17 : vector<1x32x1xf32> to vector<2x32x256xf32>
    %20 = vector.broadcast %18 : vector<2x1x256xf32> to vector<2x32x256xf32>
    %21 = arith.mulf %19, %20 : vector<2x32x256xf32>
    %22 = arith.addf %15, %21 : vector<2x32x256xf32>
    %23 = vector.extract_strided_slice %1 {offsets = [0, 3], sizes = [32, 1], strides = [1, 1]} : vector<32x4xf32> to vector<32x1xf32>
    %24 = vector.shape_cast %23 : vector<32x1xf32> to vector<1x32x1xf32>
    %25 = vector.extract_strided_slice %0 {offsets = [0, 3, 0], sizes = [2, 1, 256], strides = [1, 1, 1]} : vector<2x4x256xf32> to vector<2x1x256xf32>
    %26 = vector.broadcast %24 : vector<1x32x1xf32> to vector<2x32x256xf32>
    %27 = vector.broadcast %25 : vector<2x1x256xf32> to vector<2x32x256xf32>
    %28 = arith.mulf %26, %27 : vector<2x32x256xf32>
    %29 = arith.addf %22, %28 : vector<2x32x256xf32>
    %30 = vector.extract_strided_slice %2 {offsets = [0, 0], sizes = [32, 1], strides = [1, 1]} : vector<32x2xf32> to vector<32x1xf32>
    %31 = vector.shape_cast %30 : vector<32x1xf32> to vector<1x32x1xf32>
    %32 = vector.extract_strided_slice %2 {offsets = [0, 1], sizes = [32, 1], strides = [1, 1]} : vector<32x2xf32> to vector<32x1xf32>
    %33 = vector.shape_cast %32 : vector<32x1xf32> to vector<1x32x1xf32>
    %cst = arith.constant dense<0.000000e+00> : vector<2x32xf32>
    %34 = vector.multi_reduction <add>, %29, %cst [2] : vector<2x32x256xf32> to vector<2x32xf32>
    %35 = vector.shape_cast %34 : vector<2x32xf32> to vector<2x32x1xf32>
    %cst_6 = arith.constant 2.560000e+02 : f32
    %36 = vector.broadcast %cst_6 : f32 to vector<2x32x1xf32>
    %37 = arith.divf %35, %36 : vector<2x32x1xf32>
    %38 = vector.broadcast %37 : vector<2x32x1xf32> to vector<2x32x256xf32>
    %39 = arith.subf %29, %38 : vector<2x32x256xf32>
    %40 = arith.mulf %39, %39 : vector<2x32x256xf32>
    %cst_7 = arith.constant dense<0.000000e+00> : vector<2x32xf32>
    %41 = vector.multi_reduction <add>, %40, %cst_7 [2] : vector<2x32x256xf32> to vector<2x32xf32>
    %42 = vector.shape_cast %41 : vector<2x32xf32> to vector<2x32x1xf32>
    %cst_8 = arith.constant 2.560000e+02 : f32
    %43 = vector.broadcast %cst_8 : f32 to vector<2x32x1xf32>
    %44 = arith.divf %42, %43 : vector<2x32x1xf32>
    %45 = vector.broadcast %37 : vector<2x32x1xf32> to vector<2x32x256xf32>
    %46 = arith.subf %29, %45 : vector<2x32x256xf32>
    %cst_9 = arith.constant 9.99999974E-6 : f32
    %47 = vector.broadcast %cst_9 : f32 to vector<2x32x1xf32>
    %48 = arith.addf %44, %47 : vector<2x32x1xf32>
    %49 = math.rsqrt %48 : vector<2x32x1xf32>
    %50 = vector.broadcast %49 : vector<2x32x1xf32> to vector<2x32x256xf32>
    %51 = arith.mulf %46, %50 : vector<2x32x256xf32>
    %52 = vector.broadcast %31 : vector<1x32x1xf32> to vector<2x32x256xf32>
    %53 = arith.mulf %51, %52 : vector<2x32x256xf32>
    %54 = vector.broadcast %33 : vector<1x32x1xf32> to vector<2x32x256xf32>
    %55 = arith.addf %53, %54 : vector<2x32x256xf32>
    %c0_10 = arith.constant 0 : index
    %c0_11 = arith.constant 0 : index
    %c0_12 = arith.constant 0 : index
    %56 = vector.load %arg13[%c0_10, %c0_11, %c0_12] : memref<2x32x256xf32, #tpu.memory_space<vmem>>, vector<2x32x256xf32>
    tpu.vector_store %arg13[%c0_10, %c0_11, %c0_12], %55 {strides = array<i32>} : memref<2x32x256xf32, #tpu.memory_space<vmem>>, vector<2x32x256xf32>,
    %c0_13 = arith.constant 0 : index
    %c0_14 = arith.constant 0 : index
    %57 = vector.load %arg3[%c0_13, %c0_14] : memref<96x96xf32, #tpu.memory_space<vmem>>, vector<96x96xf32>
    %c0_15 = arith.constant 0 : index
    %c0_16 = arith.constant 0 : index
    %58 = vector.load %arg5[%c0_15, %c0_16] : memref<96x64xf32, #tpu.memory_space<vmem>>, vector<96x64xf32>
    %cst_17 = arith.constant dense<0.000000e+00> : vector<96x64xf32>
    %59 = tpu.matmul %57, %58, %cst_17 {dimension_numbers = #tpu.dot_dimension_numbers<[1], [0], [0], [1], [0, 0, 1, 1], [], []>} : vector<96x96xf32>, vector<96x64xf32>, vector<96x64xf32> -> vector<96x64xf32>
    %c0_18 = arith.constant 0 : index
    %c0_19 = arith.constant 0 : index
    %60 = vector.load %arg6[%c0_18, %c0_19] : memref<1x64xf32, #tpu.memory_space<vmem>>, vector<1x64xf32>
    %61 = vector.broadcast %60 : vector<1x64xf32> to vector<96x64xf32>
    %62 = arith.addf %59, %61 : vector<96x64xf32>
    %cst_20 = arith.constant 0.000000e+00 : f32
    %63 = vector.broadcast %cst_20 : f32 to vector<96x64xf32>
    %64 = arith.maximumf %62, %63 : vector<96x64xf32>
    %c0_21 = arith.constant 0 : index
    %c0_22 = arith.constant 0 : index
    %65 = vector.load %arg7[%c0_21, %c0_22] : memref<64x64xf32, #tpu.memory_space<vmem>>, vector<64x64xf32>
    %cst_23 = arith.constant dense<0.000000e+00> : vector<96x64xf32>
    %66 = tpu.matmul %64, %65, %cst_23 {dimension_numbers = #tpu.dot_dimension_numbers<[1], [0], [0], [1], [0, 0, 1, 1], [], []>} : vector<96x64xf32>, vector<64x64xf32>, vector<96x64xf32> -> vector<96x64xf32>
    %c0_24 = arith.constant 0 : index
    %c0_25 = arith.constant 0 : index
    %67 = vector.load %arg8[%c0_24, %c0_25] : memref<1x64xf32, #tpu.memory_space<vmem>>, vector<1x64xf32>
    %68 = vector.broadcast %67 : vector<1x64xf32> to vector<96x64xf32>
    %69 = arith.addf %66, %68 : vector<96x64xf32>
    %cst_26 = arith.constant 0.000000e+00 : f32
    %70 = vector.broadcast %cst_26 : f32 to vector<96x64xf32>
    %71 = arith.maximumf %69, %70 : vector<96x64xf32>
    %c0_27 = arith.constant 0 : index
    %c0_28 = arith.constant 0 : index
    %72 = vector.load %arg4[%c0_27, %c0_28] : memref<96x8xf32, #tpu.memory_space<vmem>>, vector<96x8xf32>
    %cst_29 = arith.constant 0.000000e+00 : f32
    %cst_30 = arith.constant 1.000000e+00 : f32
    %73 = vector.broadcast %cst_29 : f32 to vector<96x8xf32>
    %74 = arith.maximumf %73, %72 : vector<96x8xf32>
    %75 = vector.broadcast %cst_30 : f32 to vector<96x8xf32>
    %76 = arith.minimumf %75, %74 : vector<96x8xf32>
    %cst_31 = arith.constant 1.000000e-03 : f32
    %77 = vector.broadcast %cst_31 : f32 to vector<96x8xf32>
    %78 = arith.maximumf %77, %76 : vector<96x8xf32>
    %cst_32 = arith.constant 1.000000e+00 : f32
    %79 = vector.broadcast %cst_32 : f32 to vector<96x8xf32>
    %80 = arith.subf %79, %76 : vector<96x8xf32>
    %cst_33 = arith.constant 1.000000e-03 : f32
    %81 = vector.broadcast %cst_33 : f32 to vector<96x8xf32>
    %82 = arith.maximumf %81, %80 : vector<96x8xf32>
    %83 = arith.divf %78, %82 : vector<96x8xf32>
    %84 = math.log %83 : vector<96x8xf32>
    %c0_34 = arith.constant 0 : index
    %c0_35 = arith.constant 0 : index
    %85 = vector.load %arg9[%c0_34, %c0_35] : memref<64x8xf32, #tpu.memory_space<vmem>>, vector<64x8xf32>
    %cst_36 = arith.constant dense<0.000000e+00> : vector<96x8xf32>
    %86 = tpu.matmul %71, %85, %cst_36 {dimension_numbers = #tpu.dot_dimension_numbers<[1], [0], [0], [1], [0, 0, 1, 1], [], []>} : vector<96x64xf32>, vector<64x8xf32>, vector<96x8xf32> -> vector<96x8xf32>
    %c0_37 = arith.constant 0 : index
    %c0_38 = arith.constant 0 : index
    %87 = vector.load %arg10[%c0_37, %c0_38] : memref<1x8xf32, #tpu.memory_space<vmem>>, vector<1x8xf32>
    %88 = vector.broadcast %87 : vector<1x8xf32> to vector<96x8xf32>
    %89 = arith.addf %86, %88 : vector<96x8xf32>
    %90 = arith.addf %89, %84 : vector<96x8xf32>
    %91 = arith.negf %90 : vector<96x8xf32>
    %92 = math.exp %91 : vector<96x8xf32>
    %cst_39 = arith.constant 1.000000e+00 : f32
    %93 = vector.broadcast %cst_39 : f32 to vector<96x8xf32>
    %94 = arith.addf %93, %92 : vector<96x8xf32>
    %95 = arith.divf %93, %94 : vector<96x8xf32>
    %c0_40 = arith.constant 0 : index
    %c0_41 = arith.constant 0 : index
    %96 = vector.load %arg14[%c0_40, %c0_41] : memref<96x8xf32, #tpu.memory_space<vmem>>, vector<96x8xf32>
    tpu.vector_store %arg14[%c0_40, %c0_41], %95 {strides = array<i32>} : memref<96x8xf32, #tpu.memory_space<vmem>>, vector<96x8xf32>,
    %c0_42 = arith.constant 0 : index
    %c0_43 = arith.constant 0 : index
    %97 = vector.load %arg11[%c0_42, %c0_43] : memref<96x16xf32, #tpu.memory_space<vmem>>, vector<96x16xf32>
    %cst_44 = arith.constant dense<0.000000e+00> : vector<96x16xf32>
    %98 = tpu.matmul %57, %97, %cst_44 {dimension_numbers = #tpu.dot_dimension_numbers<[1], [0], [0], [1], [0, 0, 1, 1], [], []>} : vector<96x96xf32>, vector<96x16xf32>, vector<96x16xf32> -> vector<96x16xf32>
    %c0_45 = arith.constant 0 : index
    %c0_46 = arith.constant 0 : index
    %99 = vector.load %arg12[%c0_45, %c0_46] : memref<1x16xf32, #tpu.memory_space<vmem>>, vector<1x16xf32>
    %100 = vector.broadcast %99 : vector<1x16xf32> to vector<96x16xf32>
    %101 = arith.addf %98, %100 : vector<96x16xf32>
    %c0_47 = arith.constant 0 : index
    %c0_48 = arith.constant 0 : index
    %102 = vector.load %arg15[%c0_47, %c0_48] : memref<96x16xf32, #tpu.memory_space<vmem>>, vector<96x16xf32>
    tpu.vector_store %arg15[%c0_47, %c0_48], %101 {strides = array<i32>} : memref<96x16xf32, #tpu.memory_space<vmem>>, vector<96x16xf32>,
    return
  }
}

</mosaic_0001>

<bundles_post_ra>
// kernel: dino_forward.1
= control target key start
LH: loop header
LB: loop body
LE: loop exit
PB: predicated region body
PF: predicated region fallthrough
CT: control target
= control target key end

     0   :  { %v2078_v0 = vmov 0   ;;  %vm627_vm0 = vcmask 785408   ;;  %v2999_v17 = vmov 1   ;;  %v2080_v24 = vmov 2   ;;  %s2983_s1 = inlined_call_operand.vmem [shape: f32[32,4], index: 1, kind: input, shape index: {}]   ;;  %s2984_s5 = inlined_call_operand.vmem [shape: f32[96,64], index: 5, kind: input, shape index: {}]   ;;  %s2985_s3 = inlined_call_operand.vmem [shape: f32[96,96], index: 3, kind: input, shape index: {}]   ;;  %s2986_s7 = inlined_call_operand.vmem [shape: f32[64,64], index: 7, kind: input, shape index: {}]   ;;  %s2987_s0 = inlined_call_operand.vmem [shape: f32[2,4,256], index: 0, kind: input, shape index: {}]   ;;  %s2988_s6 = inlined_call_operand.vmem [shape: f32[1,64], index: 6, kind: input, shape index: {}]   ;;  %s2989_s9 = inlined_call_operand.vmem [shape: f32[64,8], index: 9, kind: input, shape index: {}]   ;;  %s2990_s2 = inlined_call_operand.vmem [shape: f32[32,2], index: 2, kind: input, shape index: {}]   ;;  %s2991_s11 = inlined_call_operand.vmem [shape: f32[96,16], index: 11, kind: input, shape index: {}]   ;;  %s2992_s8 = inlined_call_operand.vmem [shape: f32[1,64], index: 8, kind: input, shape index: {}]   ;;  %s2993_s13 = inlined_call_operand.vmem [shape: f32[2,32,256], index: 13, kind: output, shape index: {0}]   ;;  %s2994_s12 = inlined_call_operand.vmem [shape: f32[1,16], index: 12, kind: input, shape index: {}]   ;;  %s2995_s15 = inlined_call_operand.vmem [shape: f32[96,16], index: 15, kind: output, shape index: {2}]   ;;  %s2996_s4 = inlined_call_operand.vmem [shape: f32[96,8], index: 4, kind: input, shape index: {}]   ;;  %s2997_s10 = inlined_call_operand.vmem [shape: f32[1,8], index: 10, kind: input, shape index: {}]   ;;  %s2998_s14 = inlined_call_operand.vmem [shape: f32[96,8], index: 14, kind: output, shape index: {1}]  }
   0x1   :  { %1953 = vset.pattern.permute.xlu1 %v2078_v0  ;;  %1952 = vset.pattern.permute.xlu0 %v2078_v0  ;;  %v2167_v1 = vld [vmem:[%s2983_s1 + $0x10] sm:$0xff]  ;;  %v49_v2 = vld [vmem:[%s2983_s1] sm:$0xff]  ;;  %v609_v4 = vld [vmem:[%s2984_s5 + $0x8] sm:$0xff]  ;;  %v2081_v26 = vmov 3   ;;  %v79_v50 = vlaneseq  ;;  %vm816_vm1 = vcmask 523264   ;;  %vm1527_vm2 = vcmask 130048  }
   0x2   :  { %v608_v3 = vld [vmem:[%s2984_s5] sm:$0xff]  ;;  %69 = vperm.xlu1 %1953, %v2167_v1   ;;  %59 = vperm.xlu0 %1952, %v49_v2   ;;  %v52_v6 = vld [vmem:[%s2983_s1 + $0x18] sm:$0xff]  ;;  %v610_v7 = vld [vmem:[%s2984_s5 + $0x10] sm:$0xff]  ;;  %vm1370_vm3 = vcmask 64512  }
   0x3   :  { %v1856_v5 = vpack.c.bf16 %v609_v4, %v608_v3  ;;  %v611_v8 = vld [vmem:[%s2984_s5 + $0x18] sm:$0xff]  ;;  %v50_v9 = vld [vmem:[%s2983_s1 + $0x8] sm:$0xff]  ;;  %v612_v11 = vld [vmem:[%s2984_s5 + $0x20] sm:$0xff]  ;;  %v80_v51 = vshrl.u32 %v79_v50, 7 }
   0x4   :  { %v1860_v10 = vpack.c.bf16 %v611_v8, %v610_v7  ;;  %v613_v12 = vld [vmem:[%s2984_s5 + $0x28] sm:$0xff]  ;;  %v2200_v13 = vld [vmem:[%s2985_s3] sm:$0xff]  ;;  %v614_v15 = vld [vmem:[%s2984_s5 + $0x30] sm:$0xff] }
   0x5   :  { %1857 = vmatprep.subr.bf16.mxu0 %v1856_v5  ;;  %v1864_v14 = vpack.c.bf16 %v613_v12, %v612_v11  ;;  %v615_v16 = vld [vmem:[%s2984_s5 + $0x38] sm:$0xff]  ;;  %1728 = vmatprep.mubr.msk.f32.mxu0 %vm627_vm0, %v2200_v13  ;;  %v616_v19 = vld [vmem:[%s2984_s5 + $0x40] sm:$0xff]  ;;  %v617_v20 = vld [vmem:[%s2984_s5 + $0x48] sm:$0xff]  ;;  %v81_v52 = vsub.s32 0, %v80_v51  ;;  %v85_v53 = vsub.s32 4, %v80_v51  ;;  %v149_v56 = vsub.s32 1, %v80_v51 }
   0x6   :  { %1859 = vmatpush3.bf16.msra.mxu0 %v1856_v5  ;;  %74 = vperm.xlu1 %1953, %v52_v6   ;;  %v1868_v18 = vpack.c.bf16 %v615_v16, %v614_v15  ;;  %v1872_v21 = vpack.c.bf16 %v617_v20, %v616_v19  ;;  %v618_v22 = vld [vmem:[%s2984_s5 + $0x50] sm:$0xff]  ;;  %v619_v23 = vld [vmem:[%s2984_s5 + $0x58] sm:$0xff]  ;;  %v2229_v27 = vld [vmem:[%s2985_s3 + $0x8] sm:$0xff]  ;;  %v153_v57 = vsub.s32 5, %v80_v51  ;;  %v233_v60 = vsub.s32 2, %v80_v51 }
   0x7   :  { %64 = vperm.xlu0 %1952, %v50_v9   ;;  %1861 = vmatprep.subr.bf16.mxu0 %v1860_v10  ;;  %v1876_v25 = vpack.c.bf16 %v619_v23, %v618_v22  ;;  %v2234_v28 = vld [vmem:[%s2985_s3 + $0x10] sm:$0xff]  ;;  %v2243_v29 = vld [vmem:[%s2985_s3 + $0x18] sm:$0xff]  ;;  %v2248_v30 = vld [vmem:[%s2985_s3 + $0x20] sm:$0xff]  ;;  %v237_v61 = vsub.s32 6, %v80_v51  ;;  %v317_v62 = vsub.s32 3, %v80_v51  ;;  %v321_v63 = vsub.s32 7, %v80_v51 }
   0x8   :  { %v2257_v31 = vld [vmem:[%s2985_s3 + $0x28] sm:$0xff]  ;;  %v2263_v32 = vld [vmem:[%s2985_s3 + $0x30] sm:$0xff]  ;;  %v2273_v33 = vld [vmem:[%s2985_s3 + $0x38] sm:$0xff] }
   0x9   :  { %3005 = vst [vmem:[#allocation2_spill] sm:$0xff] %v2263_v32  ;;  %3006 = vst [vmem:[#allocation3_spill] sm:$0xff] %v2273_v33  ;;  %v2278_v34 = vld [vmem:[%s2985_s3 + $0x40] sm:$0xff]  ;;  %v2288_v35 = vld [vmem:[%s2985_s3 + $0x48] sm:$0xff] }
   0xa   :  { %1863 = vmatpush3.bf16.msra.mxu0 %v1860_v10  ;;  %1955 = vset.pattern.permute.xlu1 %v2999_v17  ;;  %3007 = vst [vmem:[#allocation4_spill] sm:$0xff] %v2278_v34  ;;  %3008 = vst [vmem:[#allocation5_spill] sm:$0xff] %v2288_v35  ;;  %v606_v36 = vld [vmem:[%s2985_s3 + $0x50] sm:$0xff]  ;;  %v607_v37 = vld [vmem:[%s2985_s3 + $0x58] sm:$0xff] }
   0xb   :  { %1954 = vset.pattern.permute.xlu0 %v2999_v17  ;;  %136 = vperm.xlu1 %1955, %v50_v9   ;;  %v801_v38 = vld [vmem:[%s2986_s7] sm:$0xff]  ;;  %v802_v39 = vld [vmem:[%s2986_s7 + $0x8] sm:$0xff]  ;;  %v803_v40 = vld [vmem:[%s2986_s7 + $0x10] sm:$0xff] }
   0xc   :  { %132 = vperm.xlu0 %1954, %v49_v2   ;;  %1865 = vmatprep.subr.bf16.mxu0 %v1864_v14  ;;  %v1880_v41 = vpack.c.bf16 %v802_v39, %v801_v38  ;;  %v804_v42 = vld [vmem:[%s2986_s7 + $0x18] sm:$0xff]  ;;  %v805_v44 = vld [vmem:[%s2986_s7 + $0x20] sm:$0xff]  ;;  %v806_v45 = vld [vmem:[%s2986_s7 + $0x28] sm:$0xff] }
   0xd   :  { %v1884_v43 = vpack.c.bf16 %v804_v42, %v803_v40  ;;  %v1888_v46 = vpack.c.bf16 %v806_v45, %v805_v44  ;;  %v807_v47 = vld [vmem:[%s2986_s7 + $0x30] sm:$0xff]  ;;  %v808_v48 = vld [vmem:[%s2986_s7 + $0x38] sm:$0xff]  ;;  %v47_v54 = vld [vmem:[%s2987_s0] sm:$0xff] }
   0xe   :  { %1867 = vmatpush3.bf16.msra.mxu0 %v1864_v14  ;;  %1881 = vmatprep.subr.bf16.mxu1 %v1880_v41  ;;  %v1892_v49 = vpack.c.bf16 %v808_v48, %v807_v47  ;;  %v48_v55 = vld [vmem:[%s2987_s0 + $0x8] sm:$0xff]  ;;  %v150_v4 = vrot.slane %v47_v54, %v149_v56  ;;  %v154_v5 = vrot.slane %v47_v54, %v153_v57 }
   0xf   :  { %140 = vperm.xlu1 %1955, %v2167_v1   ;;  %1869 = vmatprep.subr.bf16.mxu0 %v1868_v18  ;;  %v94_v3 = vrot.slane %v48_v55, %v85_v53  ;;  %v162_v7 = vrot.slane %v48_v55, %v153_v57  ;;  %v238_v10 = vrot.slane %v47_v54, %v237_v61 }
  0x10   :  { %144 = vperm.xlu0 %1954, %v52_v6   ;;  %1883 = vmatpush3.bf16.msra.mxu1 %v1880_v41  ;;  %v242_v11 = vrot.slane %v48_v55, %v233_v60  ;;  %v246_v12 = vrot.slane %v48_v55, %v237_v61  ;;  %v318_v14 = vrot.slane %v47_v54, %v317_v62 }
  0x11   :  { %1885 = vmatprep.subr.bf16.mxu1 %v1884_v43  ;;  %v322_v15 = vrot.slane %v47_v54, %v321_v63  ;;  %v326_v16 = vrot.slane %v48_v55, %v317_v62  ;;  %v114_v22 = vrot.slane %v94_v3, %v81_v52  ;;  %v170_v23 = vrot.slane %v150_v4, %v149_v56 }
  0x12   :  { %1871 = vmatpush3.bf16.msra.mxu0 %v1868_v18  ;;  %v330_v18 = vrot.slane %v48_v55, %v321_v63  ;;  %v2336_v38 = vrot.slane %v242_v11, %v233_v60  ;;  %v2338_v39 = vrot.slane %v246_v12, %v233_v60  ;;  %v2340_v41 = vrot.slane %v318_v14, %v317_v62 }
  0x13   :  { %1956 = vset.pattern.permute.xlu1 %v2080_v24  ;;  %1873 = vmatprep.subr.bf16.mxu0 %v1872_v21  ;;  %v2342_v42 = vrot.slane %v322_v15, %v317_v62 }
  0x14   :  { %1957 = vset.pattern.permute.xlu0 %v2080_v24  ;;  %216 = vperm.xlu1 %1956, %v49_v2   ;;  %v174_v24 = vrot.slane %v154_v5, %v149_v56  ;;  %v2346_v44 = vrot.slane %v330_v18, %v317_v62 }
  0x15   :  { %220 = vperm.xlu0 %1957, %v50_v9   ;;  %1887 = vmatpush3.bf16.msra.mxu1 %v1884_v43  ;;  %v2344_v43 = vrot.slane %v326_v16, %v317_v62 }
  0x16   :  { %1875 = vmatpush3.bf16.msra.mxu0 %v1872_v21  ;;  %1889 = vmatprep.subr.bf16.mxu1 %v1888_v46 }
  0x17   :  { %1877 = vmatprep.subr.bf16.mxu0 %v1876_v25 }
  0x18   :  { %224 = vperm.xlu1 %1956, %v2167_v1  }
  0x19   :  { %1958 = vset.pattern.permute.xlu0 %v2081_v26  ;;  %1891 = vmatpush3.bf16.msra.mxu1 %v1888_v46 }
  0x1a   :  { %1879 = vmatpush3.bf16.msra.mxu0 %v1876_v25  ;;  %300 = vperm.xlu0 %1958, %v49_v2   ;;  %v90_v2 = vrot.slane %v48_v55, %v81_v52 }
  0x1b   :  { %1893 = vmatprep.subr.bf16.mxu1 %v1892_v49 }
  0x1c   :  { %228 = vperm.xlu1 %1956, %v52_v6   ;;  %v110_v21 = vrot.slane %v90_v2, %v81_v52 }
  0x1d   :  { %1729 = vmatmul.mubr.msk.f32.vlgmr.msra.gmra.mrb[0].mxu0 %vm627_vm0, %v2229_v27  ;;  %1895 = vmatpush3.bf16.msra.mxu1 %v1892_v49 }
  0x1e   :  { %312 = vperm.xlu0 %1958, %v52_v6   ;;  %1731 = vmatprep.mubr.msk.f32.mxu0 %vm627_vm0, %v2234_v28  ;;  %v158_v6 = vrot.slane %v48_v55, %v149_v56 }
  0x20   :  { %1959 = vset.pattern.permute.xlu1 %v2081_v26  ;;  %v178_v25 = vrot.slane %v158_v6, %v149_v56  ;;  %v182_v26 = vrot.slane %v162_v7, %v149_v56 }
  0x21   :  { %1732 = vmatmul.mubr.msk.f32.gmra.mrb[2].mxu0 %vm627_vm0, %v2243_v29  ;;  %304 = vperm.xlu1 %1959, %v50_v9   ;;  %v234_v9 = vrot.slane %v47_v54, %v233_v60 }
  0x22   :  { %1734 = vmatprep.mubr.msk.f32.mxu0 %vm627_vm0, %v2248_v30  ;;  %1960 = vset.pattern.permute.xlu0 %v2078_v0 }
  0x25   :  { %1735 = vmatmul.mubr.msk.f32.gmra.mrb[4].mxu0 %vm627_vm0, %v2257_v31  ;;  %308 = vperm.xlu1 %1959, %v2167_v1   ;;  %v86_v1 = vrot.slane %v47_v54, %v85_v53 }
  0x26   :  { %1737 = vmatprep.mubr.msk.f32.mxu0 %vm627_vm0, %v2263_v32 }
  0x27   :  { %v106_v20 = vrot.slane %v86_v1, %v81_v52 }
  0x29   :  { %1738 = vmatmul.mubr.msk.f32.gmra.mrb[6].mxu0 %vm627_vm0, %v2273_v33  ;;  %1961 = vset.pattern.permute.xlu1 %v2078_v0  ;;  %v82_v0 = vrot.slane %v47_v54, %v81_v52 }
  0x2a   :  { %1740 = vmatprep.mubr.msk.f32.mxu0 %vm627_vm0, %v2278_v34 }
  0x2b   :  { %v102_v19 = vrot.slane %v82_v0, %v81_v52 }
  0x2d   :  { %1741 = vmatmul.mubr.msk.f32.gmra.mrb[8].mxu0 %vm627_vm0, %v2288_v35 }
  0x2e   :  { %1743 = vmatprep.mubr.msk.f32.mxu0 %vm627_vm0, %v606_v36  ;;  %v2332_v36 = vrot.slane %v234_v9, %v233_v60 }
  0x31   :  { %1744 = vmatmul.mubr.msk.f32.gmra.mrb[10].mxu0 %vm627_vm0, %v607_v37  ;;  %v2334_v37 = vrot.slane %v238_v10, %v233_v60 }
  0x32   :  { %1838 = vmatprep.mubr.msk.f32.mxu0 %vm627_vm0, %v2200_v13 }
  0x81   :  { %v70_v58 = vpop.permute.xlu1 %69  ;;  %v60_v59 = vpop.permute.xlu0 %59 }
  0x82   :  { %v119_v45 = vmul.f32 %v102_v19, %v70_v58  ;;  %v120_v46 = vmul.f32 %v106_v20, %v70_v58  ;;  %v127_v47 = vmul.f32 %v110_v21, %v70_v58  ;;  %v128_v48 = vmul.f32 %v114_v22, %v70_v58 }
  0x83   :  { %v115_v60 = vmul.f32 %v102_v19, %v60_v59  ;;  %v116_v61 = vmul.f32 %v106_v20, %v60_v59  ;;  %v123_v62 = vmul.f32 %v110_v21, %v60_v59  ;;  %v124_v2 = vmul.f32 %v114_v22, %v60_v59 }
  0x85   :  { %v75_v8 = vpop.permute.xlu1 %74 }
  0x86   :  { %v65_v13 = vpop.permute.xlu0 %64  ;;  %v121_v58 = vmul.f32 %v102_v19, %v75_v8  ;;  %v122_v6 = vmul.f32 %v106_v20, %v75_v8  ;;  %v129_v7 = vmul.f32 %v110_v21, %v75_v8  ;;  %v130_v9 = vmul.f32 %v114_v22, %v75_v8 }
  0x87   :  { %v117_v50 = vmul.f32 %v102_v19, %v65_v13  ;;  %v118_v51 = vmul.f32 %v106_v20, %v65_v13  ;;  %v125_v52 = vmul.f32 %v110_v21, %v65_v13  ;;  %v126_v53 = vmul.f32 %v114_v22, %v65_v13 }
  0x8a   :  { %v137_v40 = vpop.permute.xlu1 %136 }
  0x8b   :  { %v133_v49 = vpop.permute.xlu0 %132  ;;  %v185_v54 = vmul.f32 %v170_v23, %v137_v40  ;;  %v186_v55 = vmul.f32 %v174_v24, %v137_v40  ;;  %v193_v56 = vmul.f32 %v178_v25, %v137_v40  ;;  %v194_v57 = vmul.f32 %v182_v26, %v137_v40 }
  0x8c   :  { %v183_v63 = vmul.f32 %v170_v23, %v133_v49  ;;  %v184_v0 = vmul.f32 %v174_v24, %v133_v49  ;;  %v191_v3 = vmul.f32 %v178_v25, %v133_v49  ;;  %v192_v4 = vmul.f32 %v182_v26, %v133_v49 }
  0x8d   :  { %v201_v10 = vadd.f32 %v185_v54, %v117_v50  ;;  %v202_v11 = vadd.f32 %v186_v55, %v118_v51  ;;  %v209_v12 = vadd.f32 %v193_v56, %v125_v52  ;;  %v210_v13 = vadd.f32 %v194_v57, %v126_v53 }
  0x8e   :  { %v141_v1 = vpop.permute.xlu1 %140  ;;  %v199_v16 = vadd.f32 %v183_v63, %v115_v60  ;;  %v200_v18 = vadd.f32 %v184_v0, %v116_v61  ;;  %v207_v34 = vadd.f32 %v191_v3, %v123_v62  ;;  %v208_v59 = vadd.f32 %v192_v4, %v124_v2 }
  0x8f   :  { %v145_v5 = vpop.permute.xlu0 %144  ;;  %v187_v14 = vmul.f32 %v170_v23, %v141_v1  ;;  %v188_v15 = vmul.f32 %v174_v24, %v141_v1  ;;  %v195_v40 = vmul.f32 %v178_v25, %v141_v1  ;;  %v196_v17 = vmul.f32 %v182_v26, %v141_v1 }
  0x90   :  { %v189_v33 = vmul.f32 %v170_v23, %v145_v5  ;;  %v190_v49 = vmul.f32 %v174_v24, %v145_v5  ;;  %v197_v32 = vmul.f32 %v178_v25, %v145_v5  ;;  %v198_v19 = vmul.f32 %v182_v26, %v145_v5 }
  0x91   :  { %v203_v53 = vadd.f32 %v187_v14, %v119_v45  ;;  %v204_v54 = vadd.f32 %v188_v15, %v120_v46  ;;  %v2356_v26 = vadd.f32 %v195_v40, %v127_v47  ;;  %v2358_v55 = vadd.f32 %v196_v17, %v128_v48 }
  0x92   :  { %v205_v56 = vadd.f32 %v189_v33, %v121_v58  ;;  %v206_v57 = vadd.f32 %v190_v49, %v122_v6  ;;  %v213_v60 = vadd.f32 %v197_v32, %v129_v7  ;;  %v214_v61 = vadd.f32 %v198_v19, %v130_v9 }
  0x93   :  { %v217_v35 = vpop.permute.xlu1 %216 }
  0x94   :  { %v221_v20 = vpop.permute.xlu0 %220  ;;  %v267_v8 = vmul.f32 %v2332_v36, %v217_v35  ;;  %v268_v21 = vmul.f32 %v2334_v37, %v217_v35  ;;  %v275_v22 = vmul.f32 %v2336_v38, %v217_v35  ;;  %v276_v50 = vmul.f32 %v2338_v39, %v217_v35 }
  0x95   :  { %v269_v51 = vmul.f32 %v2332_v36, %v221_v20  ;;  %v270_v52 = vmul.f32 %v2334_v37, %v221_v20  ;;  %v277_v23 = vmul.f32 %v2336_v38, %v221_v20  ;;  %v278_v24 = vmul.f32 %v2338_v39, %v221_v20 }
  0x96   :  { %v283_v63 = vadd.f32 %v267_v8, %v199_v16  ;;  %v284_v0 = vadd.f32 %v268_v21, %v200_v18  ;;  %v291_v1 = vadd.f32 %v275_v22, %v207_v34  ;;  %v292_v62 = vadd.f32 %v276_v50, %v208_v59 }
  0x97   :  { %v225_v25 = vpop.permute.xlu1 %224  ;;  %v285_v2 = vadd.f32 %v269_v51, %v201_v10  ;;  %v286_v3 = vadd.f32 %v270_v52, %v202_v11  ;;  %v293_v33 = vadd.f32 %v277_v23, %v209_v12  ;;  %v294_v4 = vadd.f32 %v278_v24, %v210_v13 }
  0x98   :  { %v271_v47 = vmul.f32 %v2332_v36, %v225_v25  ;;  %v272_v17 = vmul.f32 %v2334_v37, %v225_v25  ;;  %v279_v6 = vmul.f32 %v2336_v38, %v225_v25  ;;  %v280_v7 = vmul.f32 %v2338_v39, %v225_v25 }
  0x99   :  { %v301_v35 = vpop.permute.xlu0 %300 }
  0x9a   :  { %v351_v45 = vmul.f32 %v2340_v41, %v301_v35  ;;  %v352_v46 = vmul.f32 %v2342_v42, %v301_v35  ;;  %v287_v15 = vadd.f32 %v271_v47, %v203_v53  ;;  %v288_v50 = vadd.f32 %v272_v17, %v204_v54 }
  0x9b   :  { %v229_v48 = vpop.permute.xlu1 %228  ;;  %v359_v51 = vmul.f32 %v2344_v43, %v301_v35  ;;  %v360_v52 = vmul.f32 %v2346_v44, %v301_v35 }
  0x9c   :  { %v273_v32 = vmul.f32 %v2332_v36, %v229_v48  ;;  %v274_v5 = vmul.f32 %v2334_v37, %v229_v48  ;;  %v281_v34 = vmul.f32 %v2336_v38, %v229_v48  ;;  %v282_v58 = vmul.f32 %v2338_v39, %v229_v48 }
  0x9d   :  { %v313_v9 = vpop.permute.xlu0 %312  ;;  %v2370_v10 = vadd.f32 %v351_v45, %v283_v63  ;;  %v2372_v11 = vadd.f32 %v352_v46, %v284_v0  ;;  %v2410_v0 = vadd.f32 %v359_v51, %v291_v1  ;;  %v2412_v45 = vadd.f32 %v360_v52, %v292_v62 }
  0x9e   :  { %v289_v14 = vadd.f32 %v273_v32, %v205_v56  ;;  %v290_v12 = vadd.f32 %v274_v5, %v206_v57  ;;  %v357_v13 = vmul.f32 %v2340_v41, %v313_v9  ;;  %v358_v36 = vmul.f32 %v2342_v42, %v313_v9 }
  0x9f   :  { %v383_v37 = vadd.f32 %v2372_v11, %v2370_v10  ;;  %v297_v16 = vadd.f32 %v281_v34, %v213_v60  ;;  %v298_v18 = vadd.f32 %v282_v58, %v214_v61  ;;  %v365_v59 = vmul.f32 %v2344_v43, %v313_v9 }
  0xa0   :  { %v305_v38 = vpop.permute.xlu1 %304  ;;  %v2378_v40 = vadd.f32 %v357_v13, %v289_v14  ;;  %v2380_v39 = vadd.f32 %v358_v36, %v290_v12  ;;  %v366_v49 = vmul.f32 %v2346_v44, %v313_v9  ;;  %v295_v46 = vadd.f32 %v279_v6, %v2356_v26 }
  0xa1   :  { %384 = vadd.xlane.f32.xlu1 %v383_v37  ;;  %v353_v19 = vmul.f32 %v2340_v41, %v305_v38  ;;  %v354_v20 = vmul.f32 %v2342_v42, %v305_v38  ;;  %v361_v8 = vmul.f32 %v2344_v43, %v305_v38  ;;  %v362_v21 = vmul.f32 %v2346_v44, %v305_v38 }
  0xa2   :  { %v392_v22 = vadd.f32 %v2380_v39, %v2378_v40  ;;  %v2400_v57 = vadd.f32 %v365_v59, %v297_v16  ;;  %v2402_v60 = vadd.f32 %v366_v49, %v298_v18  ;;  %v395_v26 = vadd.f32 %v2412_v45, %v2410_v0 }
  0xa3   :  { %v2392_v53 = vadd.f32 %v353_v19, %v285_v2  ;;  %v2394_v23 = vadd.f32 %v354_v20, %v286_v3  ;;  %v2396_v24 = vadd.f32 %v361_v8, %v293_v33  ;;  %v2398_v25 = vadd.f32 %v362_v21, %v294_v4 }
  0xa4   :  { %v309_v56 = vpop.permute.xlu1 %308  ;;  %v296_v2 = vadd.f32 %v280_v7, %v2358_v55 }
  0xa5   :  { %393 = vadd.xlane.f32.xlu1 %v392_v22  ;;  %v386_v54 = vadd.f32 %v2394_v23, %v2392_v53  ;;  %v398_v61 = vadd.f32 %v2398_v25, %v2396_v24  ;;  %v355_v35 = vmul.f32 %v2340_v41, %v309_v56  ;;  %v356_v63 = vmul.f32 %v2342_v42, %v309_v56 }
  0xa6   :  { %v363_v17 = vmul.f32 %v2344_v43, %v309_v56  ;;  %v364_v48 = vmul.f32 %v2346_v44, %v309_v56  ;;  %v404_v42 = vadd.f32 %v2402_v60, %v2400_v57  ;;  %v1552_v44 = vld [vmem:[%s2988_s6] ss:$0 sm:$0xff] }
  0xa7   :  { %387 = vadd.xlane.f32.xlu0 %v386_v54  ;;  %v2416_v3 = vadd.f32 %v355_v35, %v287_v15  ;;  %v2418_v47 = vadd.f32 %v356_v63, %v288_v50 }
  0xa8   :  { %v2428_v55 = vadd.f32 %v363_v17, %v295_v46  ;;  %v2430_v1 = vadd.f32 %v364_v48, %v296_v2  ;;  %v1110_v17 = vld [vmem:[%s2989_s9] sm:$0xff]  ;;  %v1111_v48 = vld [vmem:[%s2989_s9 + $0x8] sm:$0xff] }
  0xa9   :  { %399 = vadd.xlane.f32.xlu1 %v398_v61  ;;  %v389_v41 = vadd.f32 %v2418_v47, %v2416_v3 }
  0xaa   :  { %v401_v43 = vadd.f32 %v2430_v1, %v2428_v55 }
  0xab   :  { %390 = vadd.xlane.f32.xlu0 %v389_v41  ;;  %v1112_v41 = vld [vmem:[%s2989_s9 + $0x10] sm:$0xff] }
  0xad   :  { %405 = vadd.xlane.f32.xlu1 %v404_v42  ;;  %v1896_v42 = vpack.c.bf16 %v1111_v48, %v1110_v17  ;;  %v1114_v17 = vld [vmem:[%s2989_s9 + $0x20] sm:$0xff]  ;;  %v1116_v48 = vld [vmem:[%s2989_s9 + $0x30] sm:$0xff] }
  0xaf   :  { %396 = vadd.xlane.f32.xlu0 %v395_v26  ;;  %v1113_v26 = vld [vmem:[%s2989_s9 + $0x18] sm:$0xff]  ;;  %1897 = vmatprep.subr.bf16.mxu1 %v1896_v42 }
  0xb3   :  { %402 = vadd.xlane.f32.xlu0 %v401_v43  ;;  %v1900_v43 = vpack.c.bf16 %v1113_v26, %v1112_v41  ;;  %v1117_v41 = vld [vmem:[%s2989_s9 + $0x38] sm:$0xff]  ;;  %v54_v26 = vld [vmem:[%s2990_s2 + $0x8] sm:$0xff] }
  0xf0   :  { %v1730_v62 = vpop.f32.mrb[0].mxu0 }
  0xf1   :  { %v736_v33 = vadd.f32 %v1730_v62, %v1552_v44  ;;  %v730_v4 = vpop.f32.mrb[1].mxu0 }
  0xf2   :  { %v731_v32 = vadd.f32 %v1552_v44, %v730_v4 }
  0xf3   :  { %v790_v58 = vmax.f32 %v736_v33, 0.0 }
  0xf4   :  { %v789_v5 = vmax.f32 %v731_v32, 0.0  ;;  %v1733_v34 = vpop.f32.mrb[2].mxu0 }
  0xf5   :  { %v746_v6 = vadd.f32 %v1733_v34, %v1552_v44  ;;  %v740_v7 = vpop.f32.mrb[3].mxu0 }
  0xf6   :  { %v741_v9 = vadd.f32 %v1552_v44, %v740_v7  ;;  %1762 = vmatprep.mubr.msk.f32.mxu1 %vm816_vm1, %v789_v5 }
  0xf7   :  { %1763 = vmatmul.mubr.msk.f32.vlgmr.msra.gmra.mrb[0].mxu1 %vm816_vm1, %v790_v58  ;;  %v792_v13 = vmax.f32 %v746_v6, 0.0 }
  0xf8   :  { %v791_v14 = vmax.f32 %v741_v9, 0.0  ;;  %v1736_v12 = vpop.f32.mrb[4].mxu0  ;;  %1899 = vmatpush3.bf16.msra.mxu1 %v1896_v42  ;;  %v1908_v42 = vpack.c.bf16 %v1117_v41, %v1116_v48 }
  0xf9   :  { %v756_v36 = vadd.f32 %v1736_v12, %v1552_v44  ;;  %v750_v37 = vpop.f32.mrb[5].mxu0  ;;  %1901 = vmatprep.subr.bf16.mxu1 %v1900_v43 }
  0xfa   :  { %v751_v15 = vadd.f32 %v1552_v44, %v750_v37  ;;  %1765 = vmatprep.mubr.msk.f32.mxu1 %vm816_vm1, %v791_v14 }
  0xfb   :  { %1766 = vmatmul.mubr.msk.f32.gmra.mrb[2].mxu1 %vm816_vm1, %v792_v13  ;;  %v794_v38 = vmax.f32 %v756_v36, 0.0 }
  0xfc   :  { %v793_v16 = vmax.f32 %v751_v15, 0.0  ;;  %v1739_v18 = vpop.f32.mrb[6].mxu0  ;;  %1903 = vmatpush3.bf16.msra.mxu1 %v1900_v43  ;;  %v1383_v43 = vld [vmem:[%s2991_s11] sm:$0xff] }
  0xfd   :  { %v766_v59 = vadd.f32 %v1739_v18, %v1552_v44  ;;  %v760_v49 = vpop.f32.mrb[7].mxu0 }
  0xfe   :  { %v761_v19 = vadd.f32 %v1552_v44, %v760_v49  ;;  %1768 = vmatprep.mubr.msk.f32.mxu1 %vm816_vm1, %v793_v16 }
  0xff   :  { %1769 = vmatmul.mubr.msk.f32.gmra.mrb[4].mxu1 %vm816_vm1, %v794_v38  ;;  %v796_v21 = vmax.f32 %v766_v59, 0.0 }
 0x100   :  { %v795_v20 = vmax.f32 %v761_v19, 0.0  ;;  %v1742_v8 = vpop.f32.mrb[8].mxu0 }
 0x101   :  { %v776_v22 = vadd.f32 %v1742_v8, %v1552_v44  ;;  %v770_v50 = vpop.f32.mrb[9].mxu0 }
 0x102   :  { %v771_v51 = vadd.f32 %v1552_v44, %v770_v50  ;;  %1771 = vmatprep.mubr.msk.f32.mxu1 %vm816_vm1, %v795_v20 }
 0x103   :  { %1772 = vmatmul.mubr.msk.f32.gmra.mrb[6].mxu1 %vm816_vm1, %v796_v21  ;;  %v798_v54 = vmax.f32 %v776_v22, 0.0 }
 0x104   :  { %v797_v52 = vmax.f32 %v771_v51, 0.0  ;;  %v1745_v56 = vpop.f32.mrb[10].mxu0 }
 0x105   :  { %v786_v61 = vadd.f32 %v1745_v56, %v1552_v44  ;;  %v780_v35 = vpop.f32.mrb[11].mxu0 }
 0x106   :  { %v781_v63 = vadd.f32 %v1552_v44, %v780_v35  ;;  %1774 = vmatprep.mubr.msk.f32.mxu1 %vm816_vm1, %v797_v52 }
 0x107   :  { %1775 = vmatmul.mubr.msk.f32.gmra.mrb[8].mxu1 %vm816_vm1, %v798_v54  ;;  %v800_v2 = vmax.f32 %v786_v61, 0.0 }
 0x108   :  { %v799_v46 = vmax.f32 %v781_v63, 0.0 }
 0x10a   :  { %1777 = vmatprep.mubr.msk.f32.mxu1 %vm816_vm1, %v799_v46 }
 0x10b   :  { %1778 = vmatmul.mubr.msk.f32.gmra.mrb[10].mxu1 %vm816_vm1, %v800_v2 }
 0x12e   :  { %v385_v44 = vpop.xlane.xlu1 %384 }
 0x12f   :  { %v408_v62 = vmul.f32 0.00390625, %v385_v44  ;;  %v1384_v44 = vld [vmem:[%s2991_s11 + $0x8] sm:$0xff] }
 0x131   :  { %v2462_v33 = vsub.f32 %v2370_v10, %v408_v62  ;;  %v2465_v4 = vsub.f32 %v2372_v11, %v408_v62  ;;  %v2552_v62 = vpack.c.bf16 %v1384_v44, %v1383_v43 }
 0x132   :  { %v394_v32 = vpop.xlane.xlu1 %393 }
 0x133   :  { %v411_v5 = vmul.f32 0.00390625, %v394_v32  ;;  %v432_v34 = vmul.f32 %v2462_v33, %v2462_v33  ;;  %v433_v58 = vmul.f32 %v2465_v4, %v2465_v4  ;;  %v55_v32 = vld [vmem:[%s2990_s2 + $0x10] sm:$0xff]  ;;  %1913 = vmatprep.subr.bf16.mxu0 %v2552_v62 }
 0x134   :  { %v388_v6 = vpop.xlane.xlu0 %387  ;;  %1915 = vmatpush3.bf16.msra.mxu0 %v2552_v62 }
 0x135   :  { %v409_v7 = vmul.f32 0.00390625, %v388_v6  ;;  %v448_v9 = vadd.f32 %v433_v58, %v432_v34  ;;  %v2472_v12 = vsub.f32 %v2378_v40, %v411_v5  ;;  %v2481_v13 = vsub.f32 %v2380_v39, %v411_v5  ;;  %v1385_v5 = vld [vmem:[%s2991_s11 + $0x10] sm:$0xff]  ;;  %v1386_v34 = vld [vmem:[%s2991_s11 + $0x18] sm:$0xff] }
 0x136   :  { %v400_v14 = vpop.xlane.xlu1 %399  ;;  %v2566_v58 = vpack.c.bf16 %v1386_v34, %v1385_v5  ;;  %v56_v6 = vld [vmem:[%s2990_s2 + $0x18] sm:$0xff] }
 0x137   :  { %v2475_v10 = vsub.f32 %v2392_v53, %v409_v7  ;;  %v2478_v11 = vsub.f32 %v2394_v23, %v409_v7  ;;  %449 = vadd.xlane.f32.xlu0 %v448_v9  ;;  %v413_v36 = vmul.f32 0.00390625, %v400_v14  ;;  %v438_v23 = vmul.f32 %v2472_v12, %v2472_v12  ;;  %v53_v7 = vld [vmem:[%s2990_s2] sm:$0xff]  ;;  %v1388_v14 = vld [vmem:[%s2991_s11 + $0x28] sm:$0xff] }
 0x138   :  { %v391_v37 = vpop.xlane.xlu0 %390  ;;  %v439_v19 = vmul.f32 %v2481_v13, %v2481_v13  ;;  %1917 = vmatprep.subr.bf16.mxu0 %v2566_v58  ;;  %v1387_v9 = vld [vmem:[%s2991_s11 + $0x20] sm:$0xff] }
 0x139   :  { %v410_v15 = vmul.f32 0.00390625, %v391_v37  ;;  %v434_v16 = vmul.f32 %v2475_v10, %v2475_v10  ;;  %v435_v40 = vmul.f32 %v2478_v11, %v2478_v11  ;;  %v2496_v39 = vsub.f32 %v2396_v24, %v413_v36  ;;  %1919 = vmatpush3.bf16.msra.mxu0 %v2566_v58 }
 0x13a   :  { %v2499_v38 = vsub.f32 %v2398_v25, %v413_v36  ;;  %v457_v22 = vadd.f32 %v439_v19, %v438_v23  ;;  %v2582_v36 = vpack.c.bf16 %v1388_v14, %v1387_v9  ;;  %v3009_v37 = vmov 1   ;;  %v1391_v23 = vld [vmem:[%s2991_s11 + $0x40] sm:$0xff]  ;;  %v1393_v19 = vld [vmem:[%s2991_s11 + $0x50] sm:$0xff] }
 0x13b   :  { %v2488_v18 = vsub.f32 %v2416_v3, %v410_v15  ;;  %v2491_v53 = vsub.f32 %v2418_v47, %v410_v15  ;;  %v451_v49 = vadd.f32 %v435_v40, %v434_v16  ;;  %v442_v50 = vmul.f32 %v2496_v39, %v2496_v39  ;;  %v1389_v15 = vld [vmem:[%s2991_s11 + $0x30] sm:$0xff]  ;;  %v1390_v16 = vld [vmem:[%s2991_s11 + $0x38] sm:$0xff] }
 0x13c   :  { %v397_v59 = vpop.xlane.xlu0 %396  ;;  %v443_v51 = vmul.f32 %v2499_v38, %v2499_v38  ;;  %1921 = vmatprep.subr.bf16.mxu0 %v2582_v36  ;;  %v2593_v40 = vpack.c.bf16 %v1390_v16, %v1389_v15 }
 0x13d   :  { %v412_v20 = vmul.f32 0.00390625, %v397_v59  ;;  %v436_v3 = vmul.f32 %v2488_v18, %v2488_v18  ;;  %452 = vadd.xlane.f32.xlu1 %v451_v49  ;;  %v437_v47 = vmul.f32 %v2491_v53, %v2491_v53  ;;  %1923 = vmatpush3.bf16.msra.mxu0 %v2582_v36  ;;  %v1392_v59 = vld [vmem:[%s2991_s11 + $0x48] sm:$0xff] }
 0x13e   :  { %v463_v35 = vadd.f32 %v443_v51, %v442_v50  ;;  %1925 = vmatprep.subr.bf16.mxu0 %v2593_v40  ;;  %v2604_v49 = vpack.c.bf16 %v1392_v59, %v1391_v23 }
 0x13f   :  { %v2508_v8 = vsub.f32 %v2410_v0, %v412_v20  ;;  %v2511_v24 = vsub.f32 %v2412_v45, %v412_v20  ;;  %v454_v21 = vadd.f32 %v437_v47, %v436_v3  ;;  %v1394_v20 = vld [vmem:[%s2991_s11 + $0x58] sm:$0xff]  ;;  %v3010_v47 = vld [vmem:[#allocation2_spill] sm:$0xff] }
 0x140   :  { %v403_v25 = vpop.xlane.xlu0 %402  ;;  %v2614_v3 = vpack.c.bf16 %v1394_v20, %v1393_v19 }
 0x141   :  { %v414_v52 = vmul.f32 0.00390625, %v403_v25  ;;  %v440_v56 = vmul.f32 %v2508_v8, %v2508_v8  ;;  %v441_v0 = vmul.f32 %v2511_v24, %v2511_v24  ;;  %455 = vadd.xlane.f32.xlu0 %v454_v21  ;;  %458 = vadd.xlane.f32.xlu1 %v457_v22  ;;  %v3011_v25 = vld [vmem:[#allocation3_spill] sm:$0xff]  ;;  %v406_v21 = vpop.xlane.xlu1 %405  ;;  %v3013_v22 = vld [vmem:[#allocation5_spill] sm:$0xff] }
 0x142   :  { %1927 = vmatpush3.bf16.msra.mxu0 %v2593_v40 }
 0x143   :  { %v2522_v45 = vsub.f32 %v2428_v55, %v414_v52  ;;  %v2525_v54 = vsub.f32 %v2430_v1, %v414_v52  ;;  %v460_v61 = vadd.f32 %v441_v0, %v440_v56  ;;  %v1115_v55 = vld [vmem:[%s2989_s9 + $0x28] sm:$0xff]  ;;  %1929 = vmatprep.subr.bf16.mxu0 %v2604_v49  ;;  %v2649_v56 = vld [vmem:[%s2992_s8] ss:$0 sm:$0xff] }
 0x144   :  { %v1904_v1 = vpack.c.bf16 %v1115_v55, %v1114_v17 }
 0x145   :  { %v444_v63 = vmul.f32 %v2522_v45, %v2522_v45  ;;  %v445_v46 = vmul.f32 %v2525_v54, %v2525_v54  ;;  %461 = vadd.xlane.f32.xlu0 %v460_v61  ;;  %464 = vadd.xlane.f32.xlu1 %v463_v35 }
 0x146   :  { %1905 = vmatprep.subr.bf16.mxu1 %v1904_v1  ;;  %1931 = vmatpush3.bf16.msra.mxu0 %v2604_v49 }
 0x147   :  { %v466_v2 = vadd.f32 %v445_v46, %v444_v63  ;;  %1907 = vmatpush3.bf16.msra.mxu1 %v1904_v1  ;;  %1933 = vmatprep.subr.bf16.mxu0 %v2614_v3 }
 0x148   :  { %1909 = vmatprep.subr.bf16.mxu1 %v1908_v42 }
 0x149   :  { %467 = vadd.xlane.f32.xlu0 %v466_v2 }
 0x14a   :  { %1935 = vmatpush3.bf16.msra.mxu0 %v2614_v3 }
 0x14b   :  { %1911 = vmatpush3.bf16.msra.mxu1 %v1908_v42 }
 0x14c   :  { %1936 = vmatprep.subr.bf16.mxu1 %v2552_v62 }
 0x14d   :  { %1839 = vmatmul.mubr.msk.f32.vlgmr.msra.gmra.mrb[12].mxu0 %vm627_vm0, %v2229_v27  ;;  %v3012_v27 = vld [vmem:[#allocation4_spill] sm:$0xff] }
 0x14e   :  { %1841 = vmatprep.mubr.msk.f32.mxu0 %vm627_vm0, %v2234_v28  ;;  %v415_v28 = vmul.f32 0.00390625, %v406_v21 }
 0x151   :  { %1842 = vmatmul.mubr.msk.f32.gmra.mrb[14].mxu0 %vm627_vm0, %v2243_v29  ;;  %v2637_v29 = vsub.f32 %v2400_v57, %v415_v28 }
 0x152   :  { %1844 = vmatprep.mubr.msk.f32.mxu0 %vm627_vm0, %v2248_v30  ;;  %v2640_v30 = vsub.f32 %v2402_v60, %v415_v28 }
 0x154   :  { %v447_v50 = vmul.f32 %v2640_v30, %v2640_v30 }
 0x155   :  { %1845 = vmatmul.mubr.msk.f32.gmra.mrb[16].mxu0 %vm627_vm0, %v2257_v31  ;;  %v446_v31 = vmul.f32 %v2637_v29, %v2637_v29 }
 0x156   :  { %519 = vperm.xlu1 %1961, %v54_v26   ;;  %1847 = vmatprep.mubr.msk.f32.mxu0 %vm627_vm0, %v3010_v47 }
 0x157   :  { %v469_v51 = vadd.f32 %v447_v50, %v446_v31 }
 0x159   :  { %1848 = vmatmul.mubr.msk.f32.gmra.mrb[18].mxu0 %vm627_vm0, %v3011_v25 }
 0x15a   :  { %524 = vperm.xlu1 %1961, %v55_v32   ;;  %1850 = vmatprep.mubr.msk.f32.mxu0 %vm627_vm0, %v3012_v27 }
 0x15d   :  { %1851 = vmatmul.mubr.msk.f32.gmra.mrb[20].mxu0 %vm627_vm0, %v3013_v22 }
 0x15e   :  { %529 = vperm.xlu1 %1961, %v56_v6  }
 0x15f   :  { %514 = vperm.xlu0 %1960, %v53_v7  }
 0x162   :  { %1962 = vset.pattern.permute.xlu1 %v3009_v37 }
 0x163   :  { %549 = vperm.xlu1 %1962, %v53_v7   ;;  %1963 = vset.pattern.permute.xlu0 %v3009_v37 }
 0x167   :  { %553 = vperm.xlu1 %1962, %v54_v26  }
 0x16b   :  { %557 = vperm.xlu1 %1962, %v55_v32  }
 0x18f   :  { %470 = vadd.xlane.f32.xlu1 %v469_v51 }
 0x1a0   :  { %561 = vperm.xlu1 %1962, %v56_v6  }
 0x1c4   :  { %v450_v52 = vpop.xlane.xlu0 %449 }
 0x1c5   :  { %v472_v0 = vmul.f32 0.00390625, %v450_v52 }
 0x1c7   :  { %v480_v1 = vadd.f32 1e-05, %v472_v0 }
 0x1ca   :  { %v1764_v57 = vpop.f32.mrb[0].mxu1  ;;  %v453_v35 = vpop.xlane.xlu1 %452 }
 0x1cb   :  { %v925_v60 = vadd.f32 %v1764_v57, %v2649_v56  ;;  %v919_v61 = vpop.f32.mrb[1].mxu1  ;;  %v473_v46 = vmul.f32 0.00390625, %v453_v35 }
 0x1cc   :  { %v920_v63 = vadd.f32 %v2649_v56, %v919_v61 }
 0x1cd   :  { %v481_v17 = vadd.f32 1e-05, %v473_v46  ;;  %v979_v48 = vmax.f32 %v925_v60, 0.0 }
 0x1ce   :  { %v978_v2 = vmax.f32 %v920_v63, 0.0  ;;  %v1767_v55 = vpop.f32.mrb[2].mxu1  ;;  %v456_v26 = vpop.xlane.xlu0 %455 }
 0x1cf   :  { %v935_v41 = vadd.f32 %v1767_v55, %v2649_v56  ;;  %v929_v42 = vpop.f32.mrb[3].mxu1  ;;  %v474_v44 = vmul.f32 0.00390625, %v456_v26  ;;  %v2655_v32 = vpop.xlane.xlu1 %458  ;;  %1964 = vrsqrt.f32 %v481_v17 }
 0x1d0   :  { %v930_v43 = vadd.f32 %v2649_v56, %v929_v42  ;;  %1796 = vmatprep.mubr.msk.f32.mxu1 %vm816_vm1, %v978_v2  ;;  %1966 = vrsqrt.f32 %v480_v1 }
 0x1d1   :  { %1797 = vmatmul.mubr.msk.f32.vlgmr.msra.gmra.mrb[12].mxu1 %vm816_vm1, %v979_v48  ;;  %v981_v6 = vmax.f32 %v935_v41, 0.0  ;;  %v482_v7 = vadd.f32 1e-05, %v474_v44 }
 0x1d2   :  { %v980_v5 = vmax.f32 %v930_v43, 0.0  ;;  %v1770_v34 = vpop.f32.mrb[4].mxu1  ;;  %1942 = vmatpush3.bf16.msra.mxu1 %v2552_v62  ;;  %v462_v37 = vpop.xlane.xlu0 %461 }
 0x1d3   :  { %v945_v9 = vadd.f32 %v1770_v34, %v2649_v56  ;;  %v939_v14 = vpop.f32.mrb[5].mxu1  ;;  %1937 = vmatprep.subr.bf16.mxu1 %v2566_v58  ;;  %v476_v16 = vmul.f32 0.00390625, %v462_v37  ;;  %v465_v23 = vpop.xlane.xlu1 %464  ;;  %1968 = vrsqrt.f32 %v482_v7 }
 0x1d4   :  { %v940_v15 = vadd.f32 %v2649_v56, %v939_v14  ;;  %1799 = vmatprep.mubr.msk.f32.mxu1 %vm816_vm1, %v980_v5  ;;  %v477_v59 = vmul.f32 0.00390625, %v465_v23 }
 0x1d5   :  { %1800 = vmatmul.mubr.msk.f32.gmra.mrb[14].mxu1 %vm816_vm1, %v981_v6  ;;  %v484_v62 = vadd.f32 1e-05, %v476_v16  ;;  %v983_v47 = vmax.f32 %v945_v9, 0.0 }
 0x1d6   :  { %v982_v19 = vmax.f32 %v940_v15, 0.0  ;;  %v1773_v20 = vpop.f32.mrb[6].mxu1  ;;  %1943 = vmatpush3.bf16.msra.mxu1 %v2566_v58  ;;  %v485_v25 = vadd.f32 1e-05, %v477_v59  ;;  %v468_v28 = vpop.xlane.xlu0 %467 }
 0x1d7   :  { %v955_v21 = vadd.f32 %v1773_v20, %v2649_v56  ;;  %v949_v27 = vpop.f32.mrb[7].mxu1  ;;  %1938 = vmatprep.subr.bf16.mxu1 %v2582_v36  ;;  %1970 = vrsqrt.f32 %v484_v62  ;;  %v478_v31 = vmul.f32 0.00390625, %v468_v28  ;;  %v520_v50 = vpop.permute.xlu1 %519  ;;  %v2077_v28 = vld [vmem:[%s2985_s3 + $0x58] sm:$0xff] }
 0x1d8   :  { %v950_v22 = vadd.f32 %v2649_v56, %v949_v27  ;;  %1802 = vmatprep.mubr.msk.f32.mxu1 %vm816_vm1, %v982_v19  ;;  %1972 = vrsqrt.f32 %v485_v25 }
 0x1d9   :  { %1803 = vmatmul.mubr.msk.f32.gmra.mrb[16].mxu1 %vm816_vm1, %v983_v47  ;;  %v486_v51 = vadd.f32 1e-05, %v478_v31  ;;  %v1965_v57 = vpop.eup %1964  ;;  %v985_v0 = vmax.f32 %v955_v21, 0.0 }
 0x1da   :  { %v984_v58 = vmax.f32 %v950_v22, 0.0  ;;  %v1776_v52 = vpop.f32.mrb[8].mxu1  ;;  %1944 = vmatpush3.bf16.msra.mxu1 %v2582_v36  ;;  %v1967_v46 = vpop.eup %1966  ;;  %v498_v2 = vmul.f32 %v1965_v57, %v2475_v10  ;;  %v499_v42 = vmul.f32 %v1965_v57, %v2478_v11 }
 0x1db   :  { %v965_v60 = vadd.f32 %v1776_v52, %v2649_v56  ;;  %v959_v61 = vpop.f32.mrb[9].mxu1  ;;  %1939 = vmatprep.subr.bf16.mxu1 %v2593_v40  ;;  %1974 = vrsqrt.f32 %v486_v51  ;;  %v2675_v63 = vpop.permute.xlu1 %524  ;;  %v496_v43 = vmul.f32 %v1967_v46, %v2462_v33 }
 0x1dc   :  { %v960_v35 = vadd.f32 %v2649_v56, %v959_v61  ;;  %1805 = vmatprep.mubr.msk.f32.mxu1 %vm816_vm1, %v984_v58  ;;  %v534_v34 = vmul.f32 %v520_v50, %v498_v2  ;;  %v535_v15 = vmul.f32 %v520_v50, %v499_v42  ;;  %v475_v61 = vmul.f32 0.00390625, %v2655_v32 }
 0x1dd   :  { %1806 = vmatmul.mubr.msk.f32.gmra.mrb[18].mxu1 %vm816_vm1, %v985_v0  ;;  %v987_v55 = vmax.f32 %v965_v60, 0.0  ;;  %v1969_v10 = vpop.eup %1968 }
 0x1de   :  { %v986_v36 = vmax.f32 %v960_v35, 0.0  ;;  %v1779_v17 = vpop.f32.mrb[10].mxu1  ;;  %1945 = vmatpush3.bf16.msra.mxu1 %v2593_v40  ;;  %v515_v41 = vpop.permute.xlu0 %514  ;;  %v497_v40 = vmul.f32 %v1967_v46, %v2465_v4  ;;  %v500_v16 = vmul.f32 %v1969_v10, %v2488_v18  ;;  %v501_v47 = vmul.f32 %v1969_v10, %v2491_v53  ;;  %v2076_v18 = vld [vmem:[%s2985_s3 + $0x50] sm:$0xff] }
 0x1df   :  { %v975_v1 = vadd.f32 %v1779_v17, %v2649_v56  ;;  %v969_v48 = vpop.f32.mrb[11].mxu1  ;;  %1940 = vmatprep.subr.bf16.mxu1 %v2604_v49  ;;  %v2686_v44 = vpop.permute.xlu1 %529  ;;  %v532_v7 = vmul.f32 %v515_v41, %v496_v43  ;;  %v483_v35 = vadd.f32 1e-05, %v475_v61 }
 0x1e0   :  { %v970_v26 = vadd.f32 %v2649_v56, %v969_v48  ;;  %1808 = vmatprep.mubr.msk.f32.mxu1 %vm816_vm1, %v986_v36  ;;  %v533_v14 = vmul.f32 %v515_v41, %v497_v40  ;;  %v537_v58 = vmul.f32 %v2675_v63, %v501_v47 }
 0x1e1   :  { %1809 = vmatmul.mubr.msk.f32.gmra.mrb[20].mxu1 %vm816_vm1, %v987_v55  ;;  %v1971_v5 = vpop.eup %1970  ;;  %v989_v9 = vmax.f32 %v975_v1, 0.0  ;;  %1976 = vrsqrt.f32 %v483_v35 }
 0x1e2   :  { %v988_v6 = vmax.f32 %v970_v26, 0.0  ;;  %1946 = vmatpush3.bf16.msra.mxu1 %v2604_v49  ;;  %v1973_v11 = vpop.eup %1972  ;;  %v504_v56 = vmul.f32 %v1971_v5, %v2508_v8  ;;  %v505_v33 = vmul.f32 %v1971_v5, %v2511_v24 }
 0x1e3   :  { %1941 = vmatprep.subr.bf16.mxu1 %v2614_v3  ;;  %v506_v37 = vmul.f32 %v1973_v11, %v2496_v39  ;;  %v507_v4 = vmul.f32 %v1973_v11, %v2499_v38  ;;  %v550_v23 = vpop.permute.xlu1 %549 }
 0x1e4   :  { %1811 = vmatprep.mubr.msk.f32.mxu1 %vm816_vm1, %v988_v6  ;;  %v540_v49 = vmul.f32 %v515_v41, %v504_v56  ;;  %v541_v59 = vmul.f32 %v515_v41, %v505_v33  ;;  %v564_v19 = vadd.f32 %v550_v23, %v532_v7  ;;  %v565_v62 = vadd.f32 %v550_v23, %v533_v14 }
 0x1e5   :  { %1812 = vmatmul.mubr.msk.f32.gmra.mrb[22].mxu1 %vm816_vm1, %v989_v9  ;;  %v1975_v8 = vpop.eup %1974  ;;  %v542_v24 = vmul.f32 %v520_v50, %v506_v37  ;;  %v543_v20 = vmul.f32 %v520_v50, %v507_v4  ;;  %v536_v50 = vmul.f32 %v2675_v63, %v500_v16 }
 0x1e6   :  { %1947 = vmatpush3.bf16.msra.mxu1 %v2614_v3  ;;  %1853 = vmatprep.mubr.msk.f32.mxu1 %vm627_vm0, %v2076_v18  ;;  %v508_v39 = vmul.f32 %v1975_v8, %v2522_v45  ;;  %v509_v38 = vmul.f32 %v1975_v8, %v2525_v54  ;;  %v572_v25 = vadd.f32 %v550_v23, %v540_v49 }
 0x1e7   :  { %v573_v21 = vadd.f32 %v550_v23, %v541_v59  ;;  %580 = vst [vmem:[%s2993_s13] sm:$0xff] %v564_v19  ;;  %581 = vst [vmem:[%s2993_s13 + $0x8] sm:$0xff] %v565_v62  ;;  %v554_v53 = vpop.permute.xlu1 %553 }
 0x1e8   :  { %v544_v3 = vmul.f32 %v2675_v63, %v508_v39  ;;  %v545_v27 = vmul.f32 %v2675_v63, %v509_v38  ;;  %588 = vst [vmem:[%s2993_s13 + $0x40] sm:$0xff] %v572_v25  ;;  %v566_v45 = vadd.f32 %v554_v53, %v534_v34  ;;  %v567_v54 = vadd.f32 %v554_v53, %v535_v15  ;;  %v993_v39 = vld [vmem:[%s2996_s4 + $0x18] sm:$0xff]  ;;  %v992_v25 = vld [vmem:[%s2996_s4 + $0x10] sm:$0xff] }
 0x1e9   :  { %589 = vst [vmem:[%s2993_s13 + $0x48] sm:$0xff] %v573_v21  ;;  %1854 = vmatmul.mubr.msk.f32.vlgmr.msra.gmra.mrb[24].mxu1 %vm627_vm0, %v2077_v28  ;;  %v574_v22 = vadd.f32 %v554_v53, %v542_v24  ;;  %v575_v31 = vadd.f32 %v554_v53, %v543_v20  ;;  %v991_v24 = vld [vmem:[%s2996_s4 + $0x8] sm:$0xff]  ;;  %v990_v20 = vld [vmem:[%s2996_s4] sm:$0xff]  ;;  %v1005_v21 = vmax.f32 %v993_v39, 0.0 }
 0x1ea   :  { %582 = vst [vmem:[%s2993_s13 + $0x10] sm:$0xff] %v566_v45  ;;  %583 = vst [vmem:[%s2993_s13 + $0x18] sm:$0xff] %v567_v54  ;;  %v1003_v47 = vmax.f32 %v991_v24, 0.0  ;;  %v1002_v18 = vmax.f32 %v990_v20, 0.0  ;;  %v994_v54 = vld [vmem:[%s2996_s4 + $0x20] sm:$0xff] }
 0x1eb   :  { %590 = vst [vmem:[%s2993_s13 + $0x50] sm:$0xff] %v574_v22  ;;  %591 = vst [vmem:[%s2993_s13 + $0x58] sm:$0xff] %v575_v31  ;;  %v558_v51 = vpop.permute.xlu1 %557  ;;  %v1977_v63 = vpop.eup %1976  ;;  %v2848_v28 = vmin.f32 %v1005_v21, 1.0 }
 0x1ec   :  { %v568_v52 = vadd.f32 %v558_v51, %v536_v50  ;;  %v569_v57 = vadd.f32 %v558_v51, %v537_v58  ;;  %v576_v0 = vadd.f32 %v558_v51, %v544_v3  ;;  %v577_v60 = vadd.f32 %v558_v51, %v545_v27  ;;  %v995_v27 = vld [vmem:[%s2996_s4 + $0x28] sm:$0xff]  ;;  %v997_v51 = vld [vmem:[%s2996_s4 + $0x38] sm:$0xff] }
 0x1ed   :  { %v502_v46 = vmul.f32 %v1977_v63, %v2472_v12  ;;  %v503_v2 = vmul.f32 %v1977_v63, %v2481_v13  ;;  %v1015_v38 = vmin.f32 %v1003_v47, 1.0  ;;  %v2840_v53 = vmin.f32 %v1002_v18, 1.0 }
 0x1ee   :  { %584 = vst [vmem:[%s2993_s13 + $0x20] sm:$0xff] %v568_v52  ;;  %585 = vst [vmem:[%s2993_s13 + $0x28] sm:$0xff] %v569_v57  ;;  %v1004_v3 = vmax.f32 %v992_v25, 0.0  ;;  %v1007_v31 = vmax.f32 %v995_v27, 0.0  ;;  %v1006_v58 = vmax.f32 %v994_v54, 0.0  ;;  %v996_v57 = vld [vmem:[%s2996_s4 + $0x30] sm:$0xff] }
 0x1ef   :  { %592 = vst [vmem:[%s2993_s13 + $0x60] sm:$0xff] %v576_v0  ;;  %593 = vst [vmem:[%s2993_s13 + $0x68] sm:$0xff] %v577_v60  ;;  %v538_v1 = vmul.f32 %v2686_v44, %v502_v46  ;;  %v539_v48 = vmul.f32 %v2686_v44, %v503_v2  ;;  %v1039_v45 = vsub.f32 1.0, %v1015_v38  ;;  %v1038_v22 = vsub.f32 1.0, %v2840_v53 }
 0x1f0   :  { %v2851_v50 = vmin.f32 %v1004_v3, 1.0  ;;  %v1041_v0 = vsub.f32 1.0, %v2848_v28  ;;  %v2860_v61 = vmin.f32 %v1007_v31, 1.0  ;;  %v1009_v35 = vmax.f32 %v997_v51, 0.0 }
 0x1f1   :  { %v1051_v52 = vmax.f32 %v1039_v45, 0.001  ;;  %v1050_v60 = vmax.f32 %v1038_v22, 0.001  ;;  %v2863_v46 = vmin.f32 %v1006_v58, 1.0  ;;  %v1008_v2 = vmax.f32 %v996_v57, 0.0 }
 0x1f2   :  { %v1040_v63 = vsub.f32 1.0, %v2851_v50  ;;  %v1029_v24 = vmax.f32 %v2848_v28, 0.001  ;;  %v1028_v18 = vmax.f32 %v2851_v50, 0.001 }
 0x1f3   :  { %v1030_v45 = vmax.f32 %v2863_v46, 0.001 }
 0x21c   :  { %v471_v36 = vpop.xlane.xlu1 %470 }
 0x21d   :  { %v479_v17 = vmul.f32 0.00390625, %v471_v36  ;;  %v999_v36 = vld [vmem:[%s2996_s4 + $0x48] sm:$0xff] }
 0x21f   :  { %v487_v55 = vadd.f32 1e-05, %v479_v17  ;;  %v998_v17 = vld [vmem:[%s2996_s4 + $0x40] sm:$0xff] }
 0x220   :  { %v562_v41 = vpop.permute.xlu1 %561  ;;  %v1840_v34 = vpop.f32.mrb[12].mxu0 }
 0x221   :  { %1978 = vrsqrt.f32 %v487_v55  ;;  %v570_v42 = vadd.f32 %v562_v41, %v538_v1  ;;  %v571_v26 = vadd.f32 %v562_v41, %v539_v48  ;;  %v1053_v55 = vmax.f32 %v1041_v0, 0.001 }
 0x222   :  { %1980 = vrcp.f32 %v1051_v52  ;;  %v1043_v1 = vsub.f32 1.0, %v2860_v61  ;;  %v2872_v48 = vmin.f32 %v1009_v35, 1.0 }
 0x223   :  { %586 = vst [vmem:[%s2993_s13 + $0x30] sm:$0xff] %v570_v42  ;;  %587 = vst [vmem:[%s2993_s13 + $0x38] sm:$0xff] %v571_v26  ;;  %1982 = vrcp.f32 %v1050_v60  ;;  %v1001_v42 = vld [vmem:[%s2996_s4 + $0x58] sm:$0xff]  ;;  %v1052_v26 = vmax.f32 %v1040_v63, 0.001 }
 0x224   :  { %1984 = vrcp.f32 %v1053_v55  ;;  %v1033_v22 = vmax.f32 %v2872_v48, 0.001 }
 0x225   :  { %1986 = vrcp.f32 %v1052_v26 }
 0x22b   :  { %v1979_v12 = vpop.eup %1978 }
 0x22c   :  { %v510_v13 = vmul.f32 %v1979_v12, %v2637_v29  ;;  %v511_v32 = vmul.f32 %v1979_v12, %v2640_v30  ;;  %v2776_v29 = vld [vmem:[%s2994_s12] ss:$0 sm:$0xff]  ;;  %v1468_v30 = vpop.f32.mrb[13].mxu0  ;;  %v1042_v12 = vsub.f32 1.0, %v2863_v46 }
 0x22d   :  { %v1474_v6 = vadd.f32 %v1840_v34, %v2776_v29  ;;  %v1843_v7 = vpop.f32.mrb[14].mxu0 }
 0x22e   :  { %v546_v43 = vmul.f32 %v2686_v44, %v510_v13  ;;  %v547_v10 = vmul.f32 %v2686_v44, %v511_v32  ;;  %v1469_v44 = vadd.f32 %v2776_v29, %v1468_v30  ;;  %v1478_v11 = vpop.f32.mrb[15].mxu0  ;;  %v1484_v9 = vadd.f32 %v1843_v7, %v2776_v29 }
 0x22f   :  { %1529 = vst.msk [vmem:[%s2995_s15 + $0x8] sm:$0xff] %vm1527_vm2, %v1474_v6  ;;  %v1479_v56 = vadd.f32 %v2776_v29, %v1478_v11  ;;  %v1846_v33 = vpop.f32.mrb[16].mxu0  ;;  %v2878_v13 = vmin.f32 %v1008_v2, 1.0  ;;  %v1010_v32 = vmax.f32 %v998_v17, 0.0  ;;  %v1054_v6 = vmax.f32 %v1042_v12, 0.001 }
 0x230   :  { %v578_v40 = vadd.f32 %v562_v41, %v546_v43  ;;  %v579_v5 = vadd.f32 %v562_v41, %v547_v10  ;;  %1528 = vst.msk [vmem:[%s2995_s15] sm:$0xff] %vm1527_vm2, %v1469_v44  ;;  %1531 = vst.msk [vmem:[%s2995_s15 + $0x18] sm:$0xff] %vm1527_vm2, %v1484_v9  ;;  %v1488_v14 = vpop.f32.mrb[17].mxu0  ;;  %v1494_v37 = vadd.f32 %v1846_v33, %v2776_v29  ;;  %v1011_v41 = vmax.f32 %v999_v36, 0.0  ;;  %v1000_v43 = vld [vmem:[%s2996_s4 + $0x50] sm:$0xff] }
 0x231   :  { %1530 = vst.msk [vmem:[%s2995_s15 + $0x10] sm:$0xff] %vm1527_vm2, %v1479_v56  ;;  %v1489_v4 = vadd.f32 %v2776_v29, %v1488_v14  ;;  %v1849_v15 = vpop.f32.mrb[18].mxu0  ;;  %v1013_v10 = vmax.f32 %v1001_v42, 0.0  ;;  %v1012_v30 = vmax.f32 %v1000_v43, 0.0  ;;  %v1044_v44 = vsub.f32 1.0, %v2878_v13  ;;  %v1981_v56 = vpop.eup %1980 }
 0x232   :  { %594 = vst [vmem:[%s2993_s13 + $0x70] sm:$0xff] %v578_v40  ;;  %595 = vst [vmem:[%s2993_s13 + $0x78] sm:$0xff] %v579_v5  ;;  %v1498_v16 = vpop.f32.mrb[19].mxu0  ;;  %v1504_v23 = vadd.f32 %v1849_v15, %v2776_v29  ;;  %v1055_v40 = vmax.f32 %v1043_v1, 0.001  ;;  %v1045_v5 = vsub.f32 1.0, %v2872_v48 }
 0x233   :  { %1533 = vst.msk [vmem:[%s2995_s15 + $0x28] sm:$0xff] %vm1527_vm2, %v1494_v37  ;;  %1532 = vst.msk [vmem:[%s2995_s15 + $0x20] sm:$0xff] %vm1527_vm2, %v1489_v4  ;;  %v1499_v49 = vadd.f32 %v2776_v29, %v1498_v16  ;;  %v1852_v59 = vpop.f32.mrb[20].mxu0  ;;  %v2884_v34 = vmin.f32 %v1011_v41, 1.0  ;;  %v2887_v7 = vmin.f32 %v1010_v32, 1.0  ;;  %v2889_v9 = vmin.f32 %v1013_v10, 1.0  ;;  %v1983_v16 = vpop.eup %1982 }
 0x234   :  { %1535 = vst.msk [vmem:[%s2995_s15 + $0x38] sm:$0xff] %vm1527_vm2, %v1504_v23  ;;  %v1508_v19 = vpop.f32.mrb[21].mxu0  ;;  %v1514_v62 = vadd.f32 %v1852_v59, %v2776_v29  ;;  %v1027_v11 = vmax.f32 %v1015_v38, 0.001  ;;  %1988 = vrcp.f32 %v1055_v40  ;;  %v1057_v33 = vmax.f32 %v1045_v5, 0.001 }
 0x235   :  { %1534 = vst.msk [vmem:[%s2995_s15 + $0x30] sm:$0xff] %vm1527_vm2, %v1499_v49  ;;  %v1509_v8 = vadd.f32 %v2776_v29, %v1508_v19  ;;  %v1047_v14 = vsub.f32 1.0, %v2884_v34  ;;  %v2892_v37 = vmin.f32 %v1012_v30, 1.0  ;;  %1990 = vrcp.f32 %v1054_v6  ;;  %v2910_v17 = vld [vmem:[%s2997_s10] ss:$0 sm:$0xff] }
 0x236   :  { %1537 = vst.msk [vmem:[%s2995_s15 + $0x48] sm:$0xff] %vm1527_vm2, %v1514_v62  ;;  %v1056_v4 = vmax.f32 %v1044_v44, 0.001  ;;  %v1046_v15 = vsub.f32 1.0, %v2887_v7  ;;  %v1026_v23 = vmax.f32 %v2840_v53, 0.001  ;;  %v1065_v49 = vmul.f32 %v1981_v56, %v1027_v11 }
 0x237   :  { %1536 = vst.msk [vmem:[%s2995_s15 + $0x40] sm:$0xff] %vm1527_vm2, %v1509_v8  ;;  %v1049_v59 = vsub.f32 1.0, %v2889_v9  ;;  %1992 = vrcp.f32 %v1057_v33  ;;  %v1059_v19 = vmax.f32 %v1047_v14, 0.001  ;;  %v1048_v62 = vsub.f32 1.0, %v2892_v37  ;;  %v1985_v8 = vpop.eup %1984 }
 0x238   :  { %1994 = vrcp.f32 %v1056_v4  ;;  %v1058_v20 = vmax.f32 %v1046_v15, 0.001  ;;  %v1063_v47 = vmul.f32 %v1983_v16, %v1026_v23  ;;  %v1987_v39 = vpop.eup %1986  ;;  %v1069_v21 = vmul.f32 %v1985_v8, %v1029_v24 }
 0x239   :  { %1996 = vlog2.f32 %v1065_v49  ;;  %v1061_v38 = vmax.f32 %v1049_v59, 0.001  ;;  %v1060_v25 = vmax.f32 %v1048_v62, 0.001  ;;  %v1031_v53 = vmax.f32 %v2860_v61, 0.001 }
 0x23a   :  { %1998 = vrcp.f32 %v1059_v19  ;;  %v1067_v27 = vmul.f32 %v1987_v39, %v1028_v18  ;;  %v1032_v58 = vmax.f32 %v2878_v13, 0.001  ;;  %v1035_v0 = vmax.f32 %v2884_v34, 0.001 }
 0x23b   :  { %2000 = vrcp.f32 %v1058_v20  ;;  %v1034_v35 = vmax.f32 %v2887_v7, 0.001  ;;  %v1037_v2 = vmax.f32 %v2889_v9, 0.001  ;;  %v1036_v1 = vmax.f32 %v2892_v37, 0.001 }
 0x23c   :  { %2002 = vlog2.f32 %v1063_v47 }
 0x23d   :  { %2004 = vrcp.f32 %v1061_v38 }
 0x23e   :  { %v1989_v3 = vpop.eup %1988  ;;  %2006 = vrcp.f32 %v1060_v25 }
 0x23f   :  { %v1991_v54 = vpop.eup %1990  ;;  %2008 = vlog2.f32 %v1069_v21  ;;  %v1073_v28 = vmul.f32 %v1989_v3, %v1031_v53 }
 0x240   :  { %2010 = vlog2.f32 %v1067_v27  ;;  %v1071_v50 = vmul.f32 %v1991_v54, %v1030_v45 }
 0x241   :  { %v1993_v31 = vpop.eup %1992  ;;  %2012 = vlog2.f32 %v1073_v28 }
 0x242   :  { %v1995_v51 = vpop.eup %1994  ;;  %v1077_v57 = vmul.f32 %v1993_v31, %v1033_v22  ;;  %2014 = vlog2.f32 %v1071_v50 }
 0x243   :  { %v1997_v52 = vpop.eup %1996  ;;  %v1075_v61 = vmul.f32 %v1995_v51, %v1032_v58 }
 0x244   :  { %v1999_v60 = vpop.eup %1998  ;;  %2016 = vlog2.f32 %v1077_v57  ;;  %v1089_v41 = vmul.f32 0.6931472, %v1997_v52 }
 0x245   :  { %v2001_v63 = vpop.eup %2000  ;;  %v1081_v55 = vmul.f32 %v1999_v60, %v1035_v0  ;;  %2018 = vlog2.f32 %v1075_v61 }
 0x246   :  { %v2003_v46 = vpop.eup %2002  ;;  %v1079_v42 = vmul.f32 %v2001_v63, %v1034_v35 }
 0x247   :  { %v2005_v36 = vpop.eup %2004  ;;  %v1087_v13 = vmul.f32 0.6931472, %v2003_v46  ;;  %2020 = vlog2.f32 %v1081_v55 }
 0x248   :  { %v2007_v48 = vpop.eup %2006  ;;  %v1085_v40 = vmul.f32 %v2005_v36, %v1037_v2  ;;  %2022 = vlog2.f32 %v1079_v42 }
 0x249   :  { %v2009_v26 = vpop.eup %2008  ;;  %v1083_v34 = vmul.f32 %v2007_v48, %v1036_v1 }
 0x24a   :  { %v2011_v32 = vpop.eup %2010  ;;  %v1093_v6 = vmul.f32 0.6931472, %v2009_v26  ;;  %2024 = vlog2.f32 %v1085_v40 }
 0x24b   :  { %v2013_v44 = vpop.eup %2012  ;;  %v1091_v9 = vmul.f32 0.6931472, %v2011_v32  ;;  %2026 = vlog2.f32 %v1083_v34 }
 0x24c   :  { %v2015_v56 = vpop.eup %2014  ;;  %v1097_v23 = vmul.f32 0.6931472, %v2013_v44 }
 0x24d   :  { %v1095_v62 = vmul.f32 0.6931472, %v2015_v56 }
 0x24e   :  { %v2017_v49 = vpop.eup %2016 }
 0x24f   :  { %v2019_v8 = vpop.eup %2018  ;;  %v1101_v25 = vmul.f32 0.6931472, %v2017_v49 }
 0x250   :  { %v1099_v27 = vmul.f32 0.6931472, %v2019_v8 }
 0x251   :  { %v2021_v21 = vpop.eup %2020 }
 0x252   :  { %v2023_v45 = vpop.eup %2022  ;;  %v1105_v52 = vmul.f32 0.6931472, %v2021_v21 }
 0x253   :  { %v1103_v61 = vmul.f32 0.6931472, %v2023_v45 }
 0x254   :  { %v2025_v58 = vpop.eup %2024 }
 0x255   :  { %v2027_v57 = vpop.eup %2026  ;;  %v1109_v26 = vmul.f32 0.6931472, %v2025_v58 }
 0x256   :  { %v1107_v32 = vmul.f32 0.6931472, %v2027_v57 }
 0x2a4   :  { %v1798_v12 = vpop.f32.mrb[12].mxu1 }
 0x2a5   :  { %v1233_v43 = vadd.f32 %v1798_v12, %v2910_v17  ;;  %v1227_v10 = vpop.f32.mrb[13].mxu1 }
 0x2a6   :  { %v1228_v5 = vadd.f32 %v2910_v17, %v1227_v10 }
 0x2a7   :  { %v1287_v30 = vadd.f32 %v1233_v43, %v1089_v41 }
 0x2a8   :  { %v1286_v7 = vadd.f32 %v1228_v5, %v1087_v13  ;;  %v1801_v11 = vpop.f32.mrb[14].mxu1 }
 0x2a9   :  { %v1592_v33 = vmul.f32 -1.442695, %v1287_v30  ;;  %v1243_v14 = vadd.f32 %v1801_v11, %v2910_v17  ;;  %v1237_v37 = vpop.f32.mrb[15].mxu1 }
 0x2aa   :  { %v1591_v4 = vmul.f32 -1.442695, %v1286_v7  ;;  %v1238_v15 = vadd.f32 %v2910_v17, %v1237_v37 }
 0x2ab   :  { %2028 = vpow2.f32 %v1592_v33  ;;  %v1289_v16 = vadd.f32 %v1243_v14, %v1093_v6 }
 0x2ac   :  { %2030 = vpow2.f32 %v1591_v4  ;;  %v1288_v59 = vadd.f32 %v1238_v15, %v1091_v9  ;;  %v1804_v19 = vpop.f32.mrb[16].mxu1 }
 0x2ad   :  { %v1594_v24 = vmul.f32 -1.442695, %v1289_v16  ;;  %v1253_v20 = vadd.f32 %v1804_v19, %v2910_v17  ;;  %v1247_v47 = vpop.f32.mrb[17].mxu1 }
 0x2ae   :  { %v1593_v18 = vmul.f32 -1.442695, %v1288_v59  ;;  %v1248_v39 = vadd.f32 %v2910_v17, %v1247_v47 }
 0x2af   :  { %2032 = vpow2.f32 %v1594_v24  ;;  %v1291_v38 = vadd.f32 %v1253_v20, %v1097_v23 }
 0x2b0   :  { %2034 = vpow2.f32 %v1593_v18  ;;  %v1290_v53 = vadd.f32 %v1248_v39, %v1095_v62  ;;  %v1807_v3 = vpop.f32.mrb[18].mxu1 }
 0x2b1   :  { %v1596_v54 = vmul.f32 -1.442695, %v1291_v38  ;;  %v1263_v28 = vadd.f32 %v1807_v3, %v2910_v17  ;;  %v1257_v22 = vpop.f32.mrb[19].mxu1 }
 0x2b2   :  { %v1595_v31 = vmul.f32 -1.442695, %v1290_v53  ;;  %v1258_v50 = vadd.f32 %v2910_v17, %v1257_v22 }
 0x2b3   :  { %2036 = vpow2.f32 %v1596_v54  ;;  %v1293_v51 = vadd.f32 %v1263_v28, %v1101_v25 }
 0x2b4   :  { %2038 = vpow2.f32 %v1595_v31  ;;  %v1292_v0 = vadd.f32 %v1258_v50, %v1099_v27  ;;  %v1810_v60 = vpop.f32.mrb[20].mxu1 }
 0x2b5   :  { %v2029_v35 = vpop.eup %2028  ;;  %v1598_v63 = vmul.f32 -1.442695, %v1293_v51  ;;  %v1273_v46 = vadd.f32 %v1810_v60, %v2910_v17  ;;  %v1267_v2 = vpop.f32.mrb[21].mxu1 }
 0x2b6   :  { %v2031_v36 = vpop.eup %2030  ;;  %v1335_v55 = vadd.f32 1.0, %v2029_v35  ;;  %v1597_v1 = vmul.f32 -1.442695, %v1292_v0  ;;  %v1268_v48 = vadd.f32 %v2910_v17, %v1267_v2 }
 0x2b7   :  { %v1334_v41 = vadd.f32 1.0, %v2031_v36  ;;  %2040 = vpow2.f32 %v1598_v63  ;;  %v1295_v42 = vadd.f32 %v1273_v46, %v1105_v52 }
 0x2b8   :  { %2042 = vrcp.f32 %v1335_v55  ;;  %v1294_v12 = vadd.f32 %v1268_v48, %v1103_v61  ;;  %v1813_v13 = vpop.f32.mrb[22].mxu1 }
 0x2b9   :  { %v2033_v43 = vpop.eup %2032  ;;  %2044 = vrcp.f32 %v1334_v41  ;;  %v1600_v10 = vmul.f32 -1.442695, %v1295_v42  ;;  %v1283_v40 = vadd.f32 %v1813_v13, %v2910_v17  ;;  %v1277_v5 = vpop.f32.mrb[23].mxu1 }
 0x2ba   :  { %v2035_v34 = vpop.eup %2034  ;;  %v1337_v30 = vadd.f32 1.0, %v2033_v43  ;;  %2046 = vpow2.f32 %v1597_v1  ;;  %v1599_v6 = vmul.f32 -1.442695, %v1294_v12  ;;  %v1278_v44 = vadd.f32 %v2910_v17, %v1277_v5 }
 0x2bb   :  { %v1336_v7 = vadd.f32 1.0, %v2035_v34  ;;  %2048 = vpow2.f32 %v1600_v10  ;;  %v1297_v11 = vadd.f32 %v1283_v40, %v1109_v26 }
 0x2bc   :  { %2050 = vrcp.f32 %v1337_v30  ;;  %v1296_v9 = vadd.f32 %v1278_v44, %v1107_v32  ;;  %v1855_v56 = vpop.f32.mrb[24].mxu1 }
 0x2bd   :  { %v2037_v33 = vpop.eup %2036  ;;  %2052 = vrcp.f32 %v1336_v7  ;;  %v1602_v14 = vmul.f32 -1.442695, %v1297_v11  ;;  %v1524_v37 = vadd.f32 %v1855_v56, %v2776_v29  ;;  %v1518_v4 = vpop.f32.mrb[25].mxu1 }
 0x2be   :  { %v2039_v15 = vpop.eup %2038  ;;  %v1339_v16 = vadd.f32 1.0, %v2037_v33  ;;  %2054 = vpow2.f32 %v1599_v6  ;;  %v1601_v23 = vmul.f32 -1.442695, %v1296_v9  ;;  %v1519_v49 = vadd.f32 %v2776_v29, %v1518_v4 }
 0x2bf   :  { %v1338_v59 = vadd.f32 1.0, %v2039_v15  ;;  %2056 = vpow2.f32 %v1602_v14  ;;  %1539 = vst.msk [vmem:[%s2995_s15 + $0x58] sm:$0xff] %vm1527_vm2, %v1524_v37 }
 0x2c0   :  { %2058 = vrcp.f32 %v1339_v16  ;;  %1538 = vst.msk [vmem:[%s2995_s15 + $0x50] sm:$0xff] %vm1527_vm2, %v1519_v49 }
 0x2c1   :  { %v2041_v17 = vpop.eup %2040  ;;  %2060 = vrcp.f32 %v1338_v59 }
 0x2c2   :  { %v2043_v19 = vpop.eup %2042  ;;  %v1341_v62 = vadd.f32 1.0, %v2041_v17  ;;  %2062 = vpow2.f32 %v1601_v23 }
 0x2c3   :  { %v2045_v29 = vpop.eup %2044  ;;  %1372 = vst.msk [vmem:[%s2998_s14 + $0x8] sm:$0xff] %vm1370_vm3, %v2043_v19 }
 0x2c4   :  { %v2047_v8 = vpop.eup %2046  ;;  %1371 = vst.msk [vmem:[%s2998_s14] sm:$0xff] %vm1370_vm3, %v2045_v29  ;;  %2064 = vrcp.f32 %v1341_v62 }
 0x2c5   :  { %v2049_v24 = vpop.eup %2048  ;;  %v1340_v20 = vadd.f32 1.0, %v2047_v8 }
 0x2c6   :  { %v2051_v47 = vpop.eup %2050  ;;  %v1343_v18 = vadd.f32 1.0, %v2049_v24 }
 0x2c7   :  { %v2053_v39 = vpop.eup %2052  ;;  %1374 = vst.msk [vmem:[%s2998_s14 + $0x18] sm:$0xff] %vm1370_vm3, %v2051_v47  ;;  %2066 = vrcp.f32 %v1340_v20 }
 0x2c8   :  { %v2055_v38 = vpop.eup %2054  ;;  %1373 = vst.msk [vmem:[%s2998_s14 + $0x10] sm:$0xff] %vm1370_vm3, %v2053_v39  ;;  %2068 = vrcp.f32 %v1343_v18 }
 0x2c9   :  { %v2057_v25 = vpop.eup %2056  ;;  %v1342_v21 = vadd.f32 1.0, %v2055_v38 }
 0x2ca   :  { %v2059_v53 = vpop.eup %2058  ;;  %v1345_v3 = vadd.f32 1.0, %v2057_v25 }
 0x2cb   :  { %v2061_v27 = vpop.eup %2060  ;;  %1376 = vst.msk [vmem:[%s2998_s14 + $0x28] sm:$0xff] %vm1370_vm3, %v2059_v53  ;;  %2070 = vrcp.f32 %v1342_v21 }
 0x2cc   :  { %v2063_v45 = vpop.eup %2062  ;;  %1375 = vst.msk [vmem:[%s2998_s14 + $0x20] sm:$0xff] %vm1370_vm3, %v2061_v27  ;;  %2072 = vrcp.f32 %v1345_v3 }
 0x2cd   :  { %v1344_v54 = vadd.f32 1.0, %v2063_v45 }
 0x2ce   :  { %v2065_v28 = vpop.eup %2064 }
 0x2cf   :  { %1378 = vst.msk [vmem:[%s2998_s14 + $0x38] sm:$0xff] %vm1370_vm3, %v2065_v28  ;;  %2074 = vrcp.f32 %v1344_v54 }
 0x2d1   :  { %v2067_v22 = vpop.eup %2066 }
 0x2d2   :  { %v2069_v31 = vpop.eup %2068  ;;  %1377 = vst.msk [vmem:[%s2998_s14 + $0x30] sm:$0xff] %vm1370_vm3, %v2067_v22 }
 0x2d3   :  { %1380 = vst.msk [vmem:[%s2998_s14 + $0x48] sm:$0xff] %vm1370_vm3, %v2069_v31 }
 0x2d5   :  { %v2071_v50 = vpop.eup %2070 }
 0x2d6   :  { %v2073_v58 = vpop.eup %2072  ;;  %1379 = vst.msk [vmem:[%s2998_s14 + $0x40] sm:$0xff] %vm1370_vm3, %v2071_v50 }
 0x2d7   :  { %1382 = vst.msk [vmem:[%s2998_s14 + $0x58] sm:$0xff] %vm1370_vm3, %v2073_v58 }
 0x2d9   :  { %v2075_v51 = vpop.eup %2074 }
 0x2da   :  { %1381 = vst.msk [vmem:[%s2998_s14 + $0x50] sm:$0xff] %vm1370_vm3, %v2075_v51 }

</bundles_post_ra>
